<compile_context>
chip_gen: v5e
topology: v5e:2x2
jax: 0.10.0
libtpu: 0.0.40
codegen_flags: <defaults>
</compile_context>

<pallas_src>
import math
import functools

import jax
import jax.numpy as jnp
from jax import lax
from jax.experimental import pallas as pl
from jax.experimental.pallas import tpu as pltpu


def _round_up(n, m):
    return ((n + m - 1) // m) * m


def _sigmoid_via_tanh(x):
    # sigmoid(x) == 0.5 * tanh(0.5 * x) + 0.5  -> one EUP push (no exp + recip).
    return 0.5 * jnp.tanh(0.5 * x) + 0.5


def _lstm_recurrence_kernel(t_blk, hs_p, seq_len, needs_mask, unroll_n,
                            gx_ref, u_ref,               # inputs
                            hseq_ref, hT_ref, cT_ref,    # outputs
                            h_sc, c_sc):                 # f32 VMEM carries
    t = pl.program_id(1)

    @pl.when(t == 0)
    def _():
        h_sc[...] = jnp.zeros_like(h_sc)
        c_sc[...] = jnp.zeros_like(c_sc)

    mxu_dtype = u_ref.dtype
    u = u_ref[...]   # whole U, VMEM-resident (single copy, no re-DMA)

    # TODO(synk): for the tiny-batch regime (B_BLK == 8/16) an explicit
    # pltpu.matmul_push_rhs / matmul_acc_lhs / matmul_pop sequence would keep U
    # in the MXU staging registers across the unrolled steps and skip the
    # per-step RHS push; left as jnp.dot here for portability across v5e/v6e/v7x.
    def step(tt, carry):
        h, c = carry                                       # f32 carries
        gates = (jnp.dot(h.astype(mxu_dtype), u,
                         preferred_element_type=jnp.float32)
                 + gx_ref[tt])                             # (B_BLK, 4*HS_P) f32
        # hs_p is a multiple of 128 -> lane-aligned gate slices (no relayout).
        i_t = _sigmoid_via_tanh(gates[:, 0 * hs_p:1 * hs_p])
        f_t = _sigmoid_via_tanh(gates[:, 1 * hs_p:2 * hs_p])
        g_t = jnp.tanh(gates[:, 2 * hs_p:3 * hs_p])
        o_t = _sigmoid_via_tanh(gates[:, 3 * hs_p:4 * hs_p])
        c_new = f_t * c + i_t * g_t
        h_new = o_t * jnp.tanh(c_new)
        if needs_mask:
            # Tail-of-sequence padding: freeze the carries on padded steps.
            m = ((t * t_blk + tt) < seq_len).astype(jnp.float32)
            h_new = m * h_new + (1.0 - m) * h
            c_new = m * c_new + (1.0 - m) * c
        hseq_ref[tt] = h_new.astype(hseq_ref.dtype)        # lane-dense store
        return h_new, c_new

    h, c = lax.fori_loop(0, t_blk, step, (h_sc[...], c_sc[...]),
                         unroll=unroll_n)

    h_sc[...] = h
    c_sc[...] = c

    @pl.when(t == pl.num_programs(1) - 1)
    def _():
        hT_ref[...] = h.astype(hT_ref.dtype)
        cT_ref[...] = c.astype(cT_ref.dtype)


def custom_lstm_forward(x, W, U, bias, *, mxu_dtype=jnp.bfloat16):
    """x: (batch, seq, input_size). Returns (hidden_seq, (h_T, c_T)) like PyTorch.

    mxu_dtype: dtype of the matmul operands (U, per-step h, phase-1 operands).
    Accumulation, streamed pre-activations and all gate math stay float32.
    """
    bs, seq_sz, in_sz = x.shape
    hs = U.shape[0]
    out_dtype = x.dtype
    f32 = jnp.float32
    mxu_dtype = jnp.dtype(mxu_dtype)

    # ---- padded / blocked sizes (lane = 128, sublane = 8/16) -----------------
    HS_P = _round_up(hs, 128)                     # lane-aligned hidden size
    sub = 16 if mxu_dtype == jnp.bfloat16 else 8  # bf16 packs 2 rows / sublane
    B_BLK = min(_round_up(bs, sub), 128)          # big M amortizes U's MXU push
    BS_P = _round_up(bs, B_BLK)
    # Time block: least padding among {32,16,8}, preferring the larger block.
    seq_pad, neg_tb = min((_round_up(seq_sz, c), -c) for c in (32, 16, 8))
    T_BLK = -neg_tb
    needs_mask = seq_pad != seq_sz
    unroll_n = T_BLK if HS_P < 512 else min(T_BLK, 8)   # cap unroll: no vreg spill

    # ---- phase 1: input projection for ALL timesteps (one big MXU matmul) ----
    # Transpose x (cheap: in_sz columns) so gx lands directly in (seq, bs, 4*hs).
    x_t = jnp.transpose(x, (1, 0, 2)).reshape(seq_sz * bs, in_sz)
    gx = (jnp.dot(x_t.astype(mxu_dtype), W.astype(mxu_dtype),
                  preferred_element_type=f32)
          + bias.astype(f32))                               # f32 pre-activations
    gx = gx.reshape(seq_sz, bs, 4 * hs)

    if HS_P != hs:   # per-gate lane pad only when needed
        gx = jnp.pad(gx.reshape(seq_sz, bs, 4, hs),
                     ((0, 0), (0, 0), (0, 0), (0, HS_P - hs)))
        gx = gx.reshape(seq_sz, bs, 4 * HS_P)
    if seq_pad != seq_sz or BS_P != bs:
        gx = jnp.pad(gx, ((0, seq_pad - seq_sz), (0, BS_P - bs), (0, 0)))
    # gx stays f32 (accuracy): bf16 gx would compound error through the recurrence.

    if HS_P != hs:
        U_p = jnp.pad(U.reshape(hs, 4, hs),
                      ((0, HS_P - hs), (0, 0), (0, HS_P - hs)))
        U_p = U_p.reshape(HS_P, 4 * HS_P)
    else:
        U_p = U
    U_p = U_p.astype(mxu_dtype)

    # ---- phase 2: serial recurrence ------------------------------------------
    grid = (BS_P // B_BLK, seq_pad // T_BLK)
    kernel = functools.partial(_lstm_recurrence_kernel,
                               T_BLK, HS_P, seq_sz, needs_mask, unroll_n)

    # Explicit VMEM budget (v5e default scoped limit is only 16 MiB).
    out_isz = jnp.dtype(out_dtype).itemsize
    gx_blk = T_BLK * B_BLK * 4 * HS_P * 4          # f32, double-buffered
    hseq_blk = T_BLK * B_BLK * HS_P * out_isz      # double-buffered
    u_bytes = HS_P * 4 * HS_P * mxu_dtype.itemsize  # single copy (not pipelined)
    hc_blk = B_BLK * HS_P * out_isz
    scratch = 2 * B_BLK * HS_P * 4
    footprint = u_bytes + 2 * gx_blk + 2 * hseq_blk + 4 * hc_blk + scratch
    vmem_limit = int(min(max(int(footprint * 1.3) + (8 << 20), 32 << 20),
                         128 << 20))

    hseq_p, hT_p, cT_p = pl.pallas_call(
        kernel,
        out_shape=(
            jax.ShapeDtypeStruct((seq_pad, BS_P, HS_P), out_dtype),
            jax.ShapeDtypeStruct((BS_P, HS_P), out_dtype),
            jax.ShapeDtypeStruct((BS_P, HS_P), out_dtype),
        ),
        grid_spec=pltpu.PrefetchScalarGridSpec(
            num_scalar_prefetch=0,
            grid=grid,
            in_specs=[
                # streamed pre-activations: (T_BLK, B_BLK, 4*HS_P) f32 tiles
                pl.BlockSpec((T_BLK, B_BLK, 4 * HS_P), lambda b, t: (t, b, 0)),
                # recurrent weight U: whole array resident in VMEM, ONE buffer
                # (no pipelining, no double-buffer, no per-step re-DMA).
                pl.BlockSpec(memory_space=pltpu.MemorySpace.VMEM),
            ],
            out_specs=[
                pl.BlockSpec((T_BLK, B_BLK, HS_P), lambda b, t: (t, b, 0)),
                pl.BlockSpec((B_BLK, HS_P), lambda b, t: (b, 0)),
                pl.BlockSpec((B_BLK, HS_P), lambda b, t: (b, 0)),
            ],
            scratch_shapes=[
                pltpu.VMEM((B_BLK, HS_P), jnp.float32),   # h carry (f32)
                pltpu.VMEM((B_BLK, HS_P), jnp.float32),   # c carry (f32)
            ],
        ),
        compiler_params=pltpu.CompilerParams(
            # batch blocks independent -> "parallel" (sharded across the 2 TCs
            # on v7x when batch > 128); time is the serial recurrence.
            dimension_semantics=("parallel", "arbitrary"),
            vmem_limit_bytes=vmem_limit),
    )(gx, U_p)

    # Spec requires (batch, seq, hidden); keep the (cheap) epilogue transpose.
    hidden_seq = jnp.transpose(hseq_p[:seq_sz, :bs, :hs], (1, 0, 2))
    h_T = hT_p[:bs, :hs]
    c_T = cT_p[:bs, :hs]
    return hidden_seq, (h_T, c_T)


def _lstm_reference(x, W, U, bias):
    """Pure-JAX reference replicating the PyTorch loop."""
    bs, seq_sz, _ = x.shape
    hs = U.shape[0]
    h_t = jnp.zeros((bs, hs), jnp.float32)
    c_t = jnp.zeros((bs, hs), jnp.float32)
    outs = []
    for t in range(seq_sz):
        gates = x[:, t, :] @ W + h_t @ U + bias
        i_t = jax.nn.sigmoid(gates[:, :hs])
        f_t = jax.nn.sigmoid(gates[:, hs:2 * hs])
        g_t = jnp.tanh(gates[:, 2 * hs:3 * hs])
        o_t = jax.nn.sigmoid(gates[:, 3 * hs:])
        c_t = f_t * c_t + i_t * g_t
        h_t = o_t * jnp.tanh(c_t)
        outs.append(h_t)
    return jnp.stack(outs, axis=1), (h_t, c_t)


if __name__ == "__main__":
    batch, seq, input_size, hidden_size = 2, 8, 16, 32

    key = jax.random.PRNGKey(0)
    kx, kw, ku, kb = jax.random.split(key, 4)

    # Deterministic init mirroring PyTorch's uniform(-stdv, stdv).
    stdv = 1.0 / math.sqrt(hidden_size)
    W = jax.random.uniform(kw, (input_size, hidden_size * 4), jnp.float32, -stdv, stdv)
    U = jax.random.uniform(ku, (hidden_size, hidden_size * 4), jnp.float32, -stdv, stdv)
    bias = jax.random.uniform(kb, (hidden_size * 4,), jnp.float32, -stdv, stdv)
    x = jax.random.normal(kx, (batch, seq, input_size), jnp.float32)

    hs_ref, (h_ref, c_ref) = _lstm_reference(x, W, U, bias)

    # f32-operand path: tight match with the PyTorch-equivalent loop.
    fwd_f32 = jax.jit(functools.partial(custom_lstm_forward, mxu_dtype=jnp.float32))
    hidden_seq, (h_T, c_T) = jax.block_until_ready(fwd_f32(x, W, U, bias))
    assert hidden_seq.shape == (batch, seq, hidden_size)
    assert h_T.shape == (batch, hidden_size) and c_T.shape == (batch, hidden_size)
    assert jnp.allclose(hidden_seq, hs_ref, atol=1e-4)
    assert jnp.allclose(h_T, h_ref, atol=1e-4)
    assert jnp.allclose(c_T, c_ref, atol=1e-4)

    # Default bf16-MXU path (f32 accumulation, f32 gates/carries/gx): looser tol.
    fwd_bf16 = jax.jit(custom_lstm_forward)
    hseq_b, (h_b, c_b) = jax.block_until_ready(fwd_bf16(x, W, U, bias))
    assert jnp.allclose(hseq_b, hs_ref, atol=3e-2)
    assert jnp.allclose(h_b, h_ref, atol=3e-2)
    assert jnp.allclose(c_b, c_ref, atol=3e-2)

    # Odd sequence length exercises the seq-padding / tail-mask path.
    x_odd = x[:, :5, :]
    hs_ref_o, (h_ref_o, c_ref_o) = _lstm_reference(x_odd, W, U, bias)
    hseq_o, (h_o, c_o) = jax.block_until_ready(fwd_f32(x_odd, W, U, bias))
    assert hseq_o.shape == (batch, 5, hidden_size)
    assert jnp.allclose(hseq_o, hs_ref_o, atol=1e-4)
    assert jnp.allclose(h_o, h_ref_o, atol=1e-4)
    assert jnp.allclose(c_o, c_ref_o, atol=1e-4)

    print("KERNEL_OK")
</pallas_src>

<mosaic_0001>
module attributes {stable_mosaic.version = 11 : i64} {
  func.func @_lstm_recurrence_kernel(%arg0: i32, %arg1: i32, %arg2: memref<8x8x512xf32, #tpu.memory_space<vmem>>, %arg3: memref<128x512xf32, #tpu.memory_space<vmem>>, %arg4: memref<8x8x128xf32, #tpu.memory_space<vmem>>, %arg5: memref<8x128xf32, #tpu.memory_space<vmem>>, %arg6: memref<8x128xf32, #tpu.memory_space<vmem>>, %arg7: memref<8x128xf32, #tpu.memory_space<vmem>>, %arg8: memref<8x128xf32, #tpu.memory_space<vmem>>) attributes {dimension_semantics = [#tpu.dimension_semantics<parallel>, #tpu.dimension_semantics<arbitrary>], iteration_bounds = array<i64: 1, 1>, scalar_prefetch = 0 : i64, scratch_operands = 2 : i64, tpu.core_type = #tpu.core_type<tc>, window_params = [{transform_indices = @transform_0, window_bounds = array<i64: 8, 8, 512>}, {pipeline_mode = #tpu.pipeline_mode<synchronous>, transform_indices = @transform_1, window_bounds = array<i64: 128, 512>}, {transform_indices = @transform_2, window_bounds = array<i64: 8, 8, 128>}, {transform_indices = @transform_3, window_bounds = array<i64: 8, 128>}, {transform_indices = @transform_4, window_bounds = array<i64: 8, 128>}]} {
    %c0_i32 = arith.constant 0 : i32
    %0 = arith.cmpi eq, %arg1, %c0_i32 : i32
    %1 = arith.extui %0 : i1 to i32
    %c0_i32_0 = arith.constant 0 : i32
    %2 = arith.cmpi ne, %1, %c0_i32_0 : i32
    scf.if %2 {
      %cst_124 = arith.constant 0.000000e+00 : f32
      %331 = vector.broadcast %cst_124 : f32 to vector<8x128xf32>
      %c0_125 = arith.constant 0 : index
      %c0_126 = arith.constant 0 : index
      %332 = vector.load %arg7[%c0_125, %c0_126] : memref<8x128xf32, #tpu.memory_space<vmem>>, vector<8x128xf32>
      tpu.vector_store %arg7[%c0_125, %c0_126], %331 {strides = array<i32>} : memref<8x128xf32, #tpu.memory_space<vmem>>, vector<8x128xf32>,
      %cst_127 = arith.constant 0.000000e+00 : f32
      %333 = vector.broadcast %cst_127 : f32 to vector<8x128xf32>
      %c0_128 = arith.constant 0 : index
      %c0_129 = arith.constant 0 : index
      %334 = vector.load %arg8[%c0_128, %c0_129] : memref<8x128xf32, #tpu.memory_space<vmem>>, vector<8x128xf32>
      tpu.vector_store %arg8[%c0_128, %c0_129], %333 {strides = array<i32>} : memref<8x128xf32, #tpu.memory_space<vmem>>, vector<8x128xf32>,
    } else {
    }
    %c0 = arith.constant 0 : index
    %c0_1 = arith.constant 0 : index
    %3 = vector.load %arg3[%c0, %c0_1] : memref<128x512xf32, #tpu.memory_space<vmem>>, vector<128x512xf32>
    %c0_2 = arith.constant 0 : index
    %c0_3 = arith.constant 0 : index
    %4 = vector.load %arg7[%c0_2, %c0_3] : memref<8x128xf32, #tpu.memory_space<vmem>>, vector<8x128xf32>
    %c0_4 = arith.constant 0 : index
    %c0_5 = arith.constant 0 : index
    %5 = vector.load %arg8[%c0_4, %c0_5] : memref<8x128xf32, #tpu.memory_space<vmem>>, vector<8x128xf32>
    %c0_i32_6 = arith.constant 0 : i32
    %cst = arith.constant dense<0.000000e+00> : vector<8x512xf32>
    %6 = tpu.matmul %4, %3, %cst {dimension_numbers = #tpu.dot_dimension_numbers<[1], [0], [0], [1], [0, 0, 1, 1], [], []>} : vector<8x128xf32>, vector<128x512xf32>, vector<8x512xf32> -> vector<8x512xf32>
    %7 = arith.index_cast %c0_i32_6 : i32 to index
    %c0_7 = arith.constant 0 : index
    %c0_8 = arith.constant 0 : index
    %8 = vector.load %arg2[%7, %c0_7, %c0_8] : memref<8x8x512xf32, #tpu.memory_space<vmem>>, vector<1x8x512xf32>
    %9 = vector.shape_cast %8 : vector<1x8x512xf32> to vector<8x512xf32>
    %10 = arith.addf %6, %9 : vector<8x512xf32>
    %11 = vector.extract_strided_slice %10 {offsets = [0, 0], sizes = [8, 128], strides = [1, 1]} : vector<8x512xf32> to vector<8x128xf32>
    %cst_9 = arith.constant 5.000000e-01 : f32
    %12 = vector.broadcast %cst_9 : f32 to vector<8x128xf32>
    %13 = arith.mulf %12, %11 : vector<8x128xf32>
    %14 = math.tanh %13 : vector<8x128xf32>
    %cst_10 = arith.constant 5.000000e-01 : f32
    %15 = vector.broadcast %cst_10 : f32 to vector<8x128xf32>
    %16 = arith.mulf %15, %14 : vector<8x128xf32>
    %cst_11 = arith.constant 5.000000e-01 : f32
    %17 = vector.broadcast %cst_11 : f32 to vector<8x128xf32>
    %18 = arith.addf %16, %17 : vector<8x128xf32>
    %19 = vector.extract_strided_slice %10 {offsets = [0, 128], sizes = [8, 128], strides = [1, 1]} : vector<8x512xf32> to vector<8x128xf32>
    %cst_12 = arith.constant 5.000000e-01 : f32
    %20 = vector.broadcast %cst_12 : f32 to vector<8x128xf32>
    %21 = arith.mulf %20, %19 : vector<8x128xf32>
    %22 = math.tanh %21 : vector<8x128xf32>
    %cst_13 = arith.constant 5.000000e-01 : f32
    %23 = vector.broadcast %cst_13 : f32 to vector<8x128xf32>
    %24 = arith.mulf %23, %22 : vector<8x128xf32>
    %cst_14 = arith.constant 5.000000e-01 : f32
    %25 = vector.broadcast %cst_14 : f32 to vector<8x128xf32>
    %26 = arith.addf %24, %25 : vector<8x128xf32>
    %27 = vector.extract_strided_slice %10 {offsets = [0, 256], sizes = [8, 128], strides = [1, 1]} : vector<8x512xf32> to vector<8x128xf32>
    %28 = math.tanh %27 : vector<8x128xf32>
    %29 = vector.extract_strided_slice %10 {offsets = [0, 384], sizes = [8, 128], strides = [1, 1]} : vector<8x512xf32> to vector<8x128xf32>
    %cst_15 = arith.constant 5.000000e-01 : f32
    %30 = vector.broadcast %cst_15 : f32 to vector<8x128xf32>
    %31 = arith.mulf %30, %29 : vector<8x128xf32>
    %32 = math.tanh %31 : vector<8x128xf32>
    %cst_16 = arith.constant 5.000000e-01 : f32
    %33 = vector.broadcast %cst_16 : f32 to vector<8x128xf32>
    %34 = arith.mulf %33, %32 : vector<8x128xf32>
    %cst_17 = arith.constant 5.000000e-01 : f32
    %35 = vector.broadcast %cst_17 : f32 to vector<8x128xf32>
    %36 = arith.addf %34, %35 : vector<8x128xf32>
    %37 = arith.mulf %26, %5 : vector<8x128xf32>
    %38 = arith.mulf %18, %28 : vector<8x128xf32>
    %39 = arith.addf %37, %38 : vector<8x128xf32>
    %40 = math.tanh %39 : vector<8x128xf32>
    %41 = arith.mulf %36, %40 : vector<8x128xf32>
    %42 = arith.index_cast %c0_i32_6 : i32 to index
    %c0_18 = arith.constant 0 : index
    %c0_19 = arith.constant 0 : index
    %43 = vector.load %arg4[%42, %c0_18, %c0_19] : memref<8x8x128xf32, #tpu.memory_space<vmem>>, vector<1x8x128xf32>
    %44 = vector.shape_cast %43 : vector<1x8x128xf32> to vector<8x128xf32>
    %45 = vector.shape_cast %41 : vector<8x128xf32> to vector<1x8x128xf32>
    tpu.vector_store %arg4[%42, %c0_18, %c0_19], %45 {strides = array<i32>} : memref<8x8x128xf32, #tpu.memory_space<vmem>>, vector<1x8x128xf32>,
    %c1_i32 = arith.constant 1 : i32
    %cst_20 = arith.constant dense<0.000000e+00> : vector<8x512xf32>
    %46 = tpu.matmul %41, %3, %cst_20 {dimension_numbers = #tpu.dot_dimension_numbers<[1], [0], [0], [1], [0, 0, 1, 1], [], []>} : vector<8x128xf32>, vector<128x512xf32>, vector<8x512xf32> -> vector<8x512xf32>
    %47 = arith.index_cast %c1_i32 : i32 to index
    %c0_21 = arith.constant 0 : index
    %c0_22 = arith.constant 0 : index
    %48 = vector.load %arg2[%47, %c0_21, %c0_22] : memref<8x8x512xf32, #tpu.memory_space<vmem>>, vector<1x8x512xf32>
    %49 = vector.shape_cast %48 : vector<1x8x512xf32> to vector<8x512xf32>
    %50 = arith.addf %46, %49 : vector<8x512xf32>
    %51 = vector.extract_strided_slice %50 {offsets = [0, 0], sizes = [8, 128], strides = [1, 1]} : vector<8x512xf32> to vector<8x128xf32>
    %cst_23 = arith.constant 5.000000e-01 : f32
    %52 = vector.broadcast %cst_23 : f32 to vector<8x128xf32>
    %53 = arith.mulf %52, %51 : vector<8x128xf32>
    %54 = math.tanh %53 : vector<8x128xf32>
    %cst_24 = arith.constant 5.000000e-01 : f32
    %55 = vector.broadcast %cst_24 : f32 to vector<8x128xf32>
    %56 = arith.mulf %55, %54 : vector<8x128xf32>
    %cst_25 = arith.constant 5.000000e-01 : f32
    %57 = vector.broadcast %cst_25 : f32 to vector<8x128xf32>
    %58 = arith.addf %56, %57 : vector<8x128xf32>
    %59 = vector.extract_strided_slice %50 {offsets = [0, 128], sizes = [8, 128], strides = [1, 1]} : vector<8x512xf32> to vector<8x128xf32>
    %cst_26 = arith.constant 5.000000e-01 : f32
    %60 = vector.broadcast %cst_26 : f32 to vector<8x128xf32>
    %61 = arith.mulf %60, %59 : vector<8x128xf32>
    %62 = math.tanh %61 : vector<8x128xf32>
    %cst_27 = arith.constant 5.000000e-01 : f32
    %63 = vector.broadcast %cst_27 : f32 to vector<8x128xf32>
    %64 = arith.mulf %63, %62 : vector<8x128xf32>
    %cst_28 = arith.constant 5.000000e-01 : f32
    %65 = vector.broadcast %cst_28 : f32 to vector<8x128xf32>
    %66 = arith.addf %64, %65 : vector<8x128xf32>
    %67 = vector.extract_strided_slice %50 {offsets = [0, 256], sizes = [8, 128], strides = [1, 1]} : vector<8x512xf32> to vector<8x128xf32>
    %68 = math.tanh %67 : vector<8x128xf32>
    %69 = vector.extract_strided_slice %50 {offsets = [0, 384], sizes = [8, 128], strides = [1, 1]} : vector<8x512xf32> to vector<8x128xf32>
    %cst_29 = arith.constant 5.000000e-01 : f32
    %70 = vector.broadcast %cst_29 : f32 to vector<8x128xf32>
    %71 = arith.mulf %70, %69 : vector<8x128xf32>
    %72 = math.tanh %71 : vector<8x128xf32>
    %cst_30 = arith.constant 5.000000e-01 : f32
    %73 = vector.broadcast %cst_30 : f32 to vector<8x128xf32>
    %74 = arith.mulf %73, %72 : vector<8x128xf32>
    %cst_31 = arith.constant 5.000000e-01 : f32
    %75 = vector.broadcast %cst_31 : f32 to vector<8x128xf32>
    %76 = arith.addf %74, %75 : vector<8x128xf32>
    %77 = arith.mulf %66, %39 : vector<8x128xf32>
    %78 = arith.mulf %58, %68 : vector<8x128xf32>
    %79 = arith.addf %77, %78 : vector<8x128xf32>
    %80 = math.tanh %79 : vector<8x128xf32>
    %81 = arith.mulf %76, %80 : vector<8x128xf32>
    %82 = arith.index_cast %c1_i32 : i32 to index
    %c0_32 = arith.constant 0 : index
    %c0_33 = arith.constant 0 : index
    %83 = vector.load %arg4[%82, %c0_32, %c0_33] : memref<8x8x128xf32, #tpu.memory_space<vmem>>, vector<1x8x128xf32>
    %84 = vector.shape_cast %83 : vector<1x8x128xf32> to vector<8x128xf32>
    %85 = vector.shape_cast %81 : vector<8x128xf32> to vector<1x8x128xf32>
    tpu.vector_store %arg4[%82, %c0_32, %c0_33], %85 {strides = array<i32>} : memref<8x8x128xf32, #tpu.memory_space<vmem>>, vector<1x8x128xf32>,
    %c2_i32 = arith.constant 2 : i32
    %cst_34 = arith.constant dense<0.000000e+00> : vector<8x512xf32>
    %86 = tpu.matmul %81, %3, %cst_34 {dimension_numbers = #tpu.dot_dimension_numbers<[1], [0], [0], [1], [0, 0, 1, 1], [], []>} : vector<8x128xf32>, vector<128x512xf32>, vector<8x512xf32> -> vector<8x512xf32>
    %87 = arith.index_cast %c2_i32 : i32 to index
    %c0_35 = arith.constant 0 : index
    %c0_36 = arith.constant 0 : index
    %88 = vector.load %arg2[%87, %c0_35, %c0_36] : memref<8x8x512xf32, #tpu.memory_space<vmem>>, vector<1x8x512xf32>
    %89 = vector.shape_cast %88 : vector<1x8x512xf32> to vector<8x512xf32>
    %90 = arith.addf %86, %89 : vector<8x512xf32>
    %91 = vector.extract_strided_slice %90 {offsets = [0, 0], sizes = [8, 128], strides = [1, 1]} : vector<8x512xf32> to vector<8x128xf32>
    %cst_37 = arith.constant 5.000000e-01 : f32
    %92 = vector.broadcast %cst_37 : f32 to vector<8x128xf32>
    %93 = arith.mulf %92, %91 : vector<8x128xf32>
    %94 = math.tanh %93 : vector<8x128xf32>
    %cst_38 = arith.constant 5.000000e-01 : f32
    %95 = vector.broadcast %cst_38 : f32 to vector<8x128xf32>
    %96 = arith.mulf %95, %94 : vector<8x128xf32>
    %cst_39 = arith.constant 5.000000e-01 : f32
    %97 = vector.broadcast %cst_39 : f32 to vector<8x128xf32>
    %98 = arith.addf %96, %97 : vector<8x128xf32>
    %99 = vector.extract_strided_slice %90 {offsets = [0, 128], sizes = [8, 128], strides = [1, 1]} : vector<8x512xf32> to vector<8x128xf32>
    %cst_40 = arith.constant 5.000000e-01 : f32
    %100 = vector.broadcast %cst_40 : f32 to vector<8x128xf32>
    %101 = arith.mulf %100, %99 : vector<8x128xf32>
    %102 = math.tanh %101 : vector<8x128xf32>
    %cst_41 = arith.constant 5.000000e-01 : f32
    %103 = vector.broadcast %cst_41 : f32 to vector<8x128xf32>
    %104 = arith.mulf %103, %102 : vector<8x128xf32>
    %cst_42 = arith.constant 5.000000e-01 : f32
    %105 = vector.broadcast %cst_42 : f32 to vector<8x128xf32>
    %106 = arith.addf %104, %105 : vector<8x128xf32>
    %107 = vector.extract_strided_slice %90 {offsets = [0, 256], sizes = [8, 128], strides = [1, 1]} : vector<8x512xf32> to vector<8x128xf32>
    %108 = math.tanh %107 : vector<8x128xf32>
    %109 = vector.extract_strided_slice %90 {offsets = [0, 384], sizes = [8, 128], strides = [1, 1]} : vector<8x512xf32> to vector<8x128xf32>
    %cst_43 = arith.constant 5.000000e-01 : f32
    %110 = vector.broadcast %cst_43 : f32 to vector<8x128xf32>
    %111 = arith.mulf %110, %109 : vector<8x128xf32>
    %112 = math.tanh %111 : vector<8x128xf32>
    %cst_44 = arith.constant 5.000000e-01 : f32
    %113 = vector.broadcast %cst_44 : f32 to vector<8x128xf32>
    %114 = arith.mulf %113, %112 : vector<8x128xf32>
    %cst_45 = arith.constant 5.000000e-01 : f32
    %115 = vector.broadcast %cst_45 : f32 to vector<8x128xf32>
    %116 = arith.addf %114, %115 : vector<8x128xf32>
    %117 = arith.mulf %106, %79 : vector<8x128xf32>
    %118 = arith.mulf %98, %108 : vector<8x128xf32>
    %119 = arith.addf %117, %118 : vector<8x128xf32>
    %120 = math.tanh %119 : vector<8x128xf32>
    %121 = arith.mulf %116, %120 : vector<8x128xf32>
    %122 = arith.index_cast %c2_i32 : i32 to index
    %c0_46 = arith.constant 0 : index
    %c0_47 = arith.constant 0 : index
    %123 = vector.load %arg4[%122, %c0_46, %c0_47] : memref<8x8x128xf32, #tpu.memory_space<vmem>>, vector<1x8x128xf32>
    %124 = vector.shape_cast %123 : vector<1x8x128xf32> to vector<8x128xf32>
    %125 = vector.shape_cast %121 : vector<8x128xf32> to vector<1x8x128xf32>
    tpu.vector_store %arg4[%122, %c0_46, %c0_47], %125 {strides = array<i32>} : memref<8x8x128xf32, #tpu.memory_space<vmem>>, vector<1x8x128xf32>,
    %c3_i32 = arith.constant 3 : i32
    %cst_48 = arith.constant dense<0.000000e+00> : vector<8x512xf32>
    %126 = tpu.matmul %121, %3, %cst_48 {dimension_numbers = #tpu.dot_dimension_numbers<[1], [0], [0], [1], [0, 0, 1, 1], [], []>} : vector<8x128xf32>, vector<128x512xf32>, vector<8x512xf32> -> vector<8x512xf32>
    %127 = arith.index_cast %c3_i32 : i32 to index
    %c0_49 = arith.constant 0 : index
    %c0_50 = arith.constant 0 : index
    %128 = vector.load %arg2[%127, %c0_49, %c0_50] : memref<8x8x512xf32, #tpu.memory_space<vmem>>, vector<1x8x512xf32>
    %129 = vector.shape_cast %128 : vector<1x8x512xf32> to vector<8x512xf32>
    %130 = arith.addf %126, %129 : vector<8x512xf32>
    %131 = vector.extract_strided_slice %130 {offsets = [0, 0], sizes = [8, 128], strides = [1, 1]} : vector<8x512xf32> to vector<8x128xf32>
    %cst_51 = arith.constant 5.000000e-01 : f32
    %132 = vector.broadcast %cst_51 : f32 to vector<8x128xf32>
    %133 = arith.mulf %132, %131 : vector<8x128xf32>
    %134 = math.tanh %133 : vector<8x128xf32>
    %cst_52 = arith.constant 5.000000e-01 : f32
    %135 = vector.broadcast %cst_52 : f32 to vector<8x128xf32>
    %136 = arith.mulf %135, %134 : vector<8x128xf32>
    %cst_53 = arith.constant 5.000000e-01 : f32
    %137 = vector.broadcast %cst_53 : f32 to vector<8x128xf32>
    %138 = arith.addf %136, %137 : vector<8x128xf32>
    %139 = vector.extract_strided_slice %130 {offsets = [0, 128], sizes = [8, 128], strides = [1, 1]} : vector<8x512xf32> to vector<8x128xf32>
    %cst_54 = arith.constant 5.000000e-01 : f32
    %140 = vector.broadcast %cst_54 : f32 to vector<8x128xf32>
    %141 = arith.mulf %140, %139 : vector<8x128xf32>
    %142 = math.tanh %141 : vector<8x128xf32>
    %cst_55 = arith.constant 5.000000e-01 : f32
    %143 = vector.broadcast %cst_55 : f32 to vector<8x128xf32>
    %144 = arith.mulf %143, %142 : vector<8x128xf32>
    %cst_56 = arith.constant 5.000000e-01 : f32
    %145 = vector.broadcast %cst_56 : f32 to vector<8x128xf32>
    %146 = arith.addf %144, %145 : vector<8x128xf32>
    %147 = vector.extract_strided_slice %130 {offsets = [0, 256], sizes = [8, 128], strides = [1, 1]} : vector<8x512xf32> to vector<8x128xf32>
    %148 = math.tanh %147 : vector<8x128xf32>
    %149 = vector.extract_strided_slice %130 {offsets = [0, 384], sizes = [8, 128], strides = [1, 1]} : vector<8x512xf32> to vector<8x128xf32>
    %cst_57 = arith.constant 5.000000e-01 : f32
    %150 = vector.broadcast %cst_57 : f32 to vector<8x128xf32>
    %151 = arith.mulf %150, %149 : vector<8x128xf32>
    %152 = math.tanh %151 : vector<8x128xf32>
    %cst_58 = arith.constant 5.000000e-01 : f32
    %153 = vector.broadcast %cst_58 : f32 to vector<8x128xf32>
    %154 = arith.mulf %153, %152 : vector<8x128xf32>
    %cst_59 = arith.constant 5.000000e-01 : f32
    %155 = vector.broadcast %cst_59 : f32 to vector<8x128xf32>
    %156 = arith.addf %154, %155 : vector<8x128xf32>
    %157 = arith.mulf %146, %119 : vector<8x128xf32>
    %158 = arith.mulf %138, %148 : vector<8x128xf32>
    %159 = arith.addf %157, %158 : vector<8x128xf32>
    %160 = math.tanh %159 : vector<8x128xf32>
    %161 = arith.mulf %156, %160 : vector<8x128xf32>
    %162 = arith.index_cast %c3_i32 : i32 to index
    %c0_60 = arith.constant 0 : index
    %c0_61 = arith.constant 0 : index
    %163 = vector.load %arg4[%162, %c0_60, %c0_61] : memref<8x8x128xf32, #tpu.memory_space<vmem>>, vector<1x8x128xf32>
    %164 = vector.shape_cast %163 : vector<1x8x128xf32> to vector<8x128xf32>
    %165 = vector.shape_cast %161 : vector<8x128xf32> to vector<1x8x128xf32>
    tpu.vector_store %arg4[%162, %c0_60, %c0_61], %165 {strides = array<i32>} : memref<8x8x128xf32, #tpu.memory_space<vmem>>, vector<1x8x128xf32>,
    %c4_i32 = arith.constant 4 : i32
    %cst_62 = arith.constant dense<0.000000e+00> : vector<8x512xf32>
    %166 = tpu.matmul %161, %3, %cst_62 {dimension_numbers = #tpu.dot_dimension_numbers<[1], [0], [0], [1], [0, 0, 1, 1], [], []>} : vector<8x128xf32>, vector<128x512xf32>, vector<8x512xf32> -> vector<8x512xf32>
    %167 = arith.index_cast %c4_i32 : i32 to index
    %c0_63 = arith.constant 0 : index
    %c0_64 = arith.constant 0 : index
    %168 = vector.load %arg2[%167, %c0_63, %c0_64] : memref<8x8x512xf32, #tpu.memory_space<vmem>>, vector<1x8x512xf32>
    %169 = vector.shape_cast %168 : vector<1x8x512xf32> to vector<8x512xf32>
    %170 = arith.addf %166, %169 : vector<8x512xf32>
    %171 = vector.extract_strided_slice %170 {offsets = [0, 0], sizes = [8, 128], strides = [1, 1]} : vector<8x512xf32> to vector<8x128xf32>
    %cst_65 = arith.constant 5.000000e-01 : f32
    %172 = vector.broadcast %cst_65 : f32 to vector<8x128xf32>
    %173 = arith.mulf %172, %171 : vector<8x128xf32>
    %174 = math.tanh %173 : vector<8x128xf32>
    %cst_66 = arith.constant 5.000000e-01 : f32
    %175 = vector.broadcast %cst_66 : f32 to vector<8x128xf32>
    %176 = arith.mulf %175, %174 : vector<8x128xf32>
    %cst_67 = arith.constant 5.000000e-01 : f32
    %177 = vector.broadcast %cst_67 : f32 to vector<8x128xf32>
    %178 = arith.addf %176, %177 : vector<8x128xf32>
    %179 = vector.extract_strided_slice %170 {offsets = [0, 128], sizes = [8, 128], strides = [1, 1]} : vector<8x512xf32> to vector<8x128xf32>
    %cst_68 = arith.constant 5.000000e-01 : f32
    %180 = vector.broadcast %cst_68 : f32 to vector<8x128xf32>
    %181 = arith.mulf %180, %179 : vector<8x128xf32>
    %182 = math.tanh %181 : vector<8x128xf32>
    %cst_69 = arith.constant 5.000000e-01 : f32
    %183 = vector.broadcast %cst_69 : f32 to vector<8x128xf32>
    %184 = arith.mulf %183, %182 : vector<8x128xf32>
    %cst_70 = arith.constant 5.000000e-01 : f32
    %185 = vector.broadcast %cst_70 : f32 to vector<8x128xf32>
    %186 = arith.addf %184, %185 : vector<8x128xf32>
    %187 = vector.extract_strided_slice %170 {offsets = [0, 256], sizes = [8, 128], strides = [1, 1]} : vector<8x512xf32> to vector<8x128xf32>
    %188 = math.tanh %187 : vector<8x128xf32>
    %189 = vector.extract_strided_slice %170 {offsets = [0, 384], sizes = [8, 128], strides = [1, 1]} : vector<8x512xf32> to vector<8x128xf32>
    %cst_71 = arith.constant 5.000000e-01 : f32
    %190 = vector.broadcast %cst_71 : f32 to vector<8x128xf32>
    %191 = arith.mulf %190, %189 : vector<8x128xf32>
    %192 = math.tanh %191 : vector<8x128xf32>
    %cst_72 = arith.constant 5.000000e-01 : f32
    %193 = vector.broadcast %cst_72 : f32 to vector<8x128xf32>
    %194 = arith.mulf %193, %192 : vector<8x128xf32>
    %cst_73 = arith.constant 5.000000e-01 : f32
    %195 = vector.broadcast %cst_73 : f32 to vector<8x128xf32>
    %196 = arith.addf %194, %195 : vector<8x128xf32>
    %197 = arith.mulf %186, %159 : vector<8x128xf32>
    %198 = arith.mulf %178, %188 : vector<8x128xf32>
    %199 = arith.addf %197, %198 : vector<8x128xf32>
    %200 = math.tanh %199 : vector<8x128xf32>
    %201 = arith.mulf %196, %200 : vector<8x128xf32>
    %202 = arith.index_cast %c4_i32 : i32 to index
    %c0_74 = arith.constant 0 : index
    %c0_75 = arith.constant 0 : index
    %203 = vector.load %arg4[%202, %c0_74, %c0_75] : memref<8x8x128xf32, #tpu.memory_space<vmem>>, vector<1x8x128xf32>
    %204 = vector.shape_cast %203 : vector<1x8x128xf32> to vector<8x128xf32>
    %205 = vector.shape_cast %201 : vector<8x128xf32> to vector<1x8x128xf32>
    tpu.vector_store %arg4[%202, %c0_74, %c0_75], %205 {strides = array<i32>} : memref<8x8x128xf32, #tpu.memory_space<vmem>>, vector<1x8x128xf32>,
    %c5_i32 = arith.constant 5 : i32
    %cst_76 = arith.constant dense<0.000000e+00> : vector<8x512xf32>
    %206 = tpu.matmul %201, %3, %cst_76 {dimension_numbers = #tpu.dot_dimension_numbers<[1], [0], [0], [1], [0, 0, 1, 1], [], []>} : vector<8x128xf32>, vector<128x512xf32>, vector<8x512xf32> -> vector<8x512xf32>
    %207 = arith.index_cast %c5_i32 : i32 to index
    %c0_77 = arith.constant 0 : index
    %c0_78 = arith.constant 0 : index
    %208 = vector.load %arg2[%207, %c0_77, %c0_78] : memref<8x8x512xf32, #tpu.memory_space<vmem>>, vector<1x8x512xf32>
    %209 = vector.shape_cast %208 : vector<1x8x512xf32> to vector<8x512xf32>
    %210 = arith.addf %206, %209 : vector<8x512xf32>
    %211 = vector.extract_strided_slice %210 {offsets = [0, 0], sizes = [8, 128], strides = [1, 1]} : vector<8x512xf32> to vector<8x128xf32>
    %cst_79 = arith.constant 5.000000e-01 : f32
    %212 = vector.broadcast %cst_79 : f32 to vector<8x128xf32>
    %213 = arith.mulf %212, %211 : vector<8x128xf32>
    %214 = math.tanh %213 : vector<8x128xf32>
    %cst_80 = arith.constant 5.000000e-01 : f32
    %215 = vector.broadcast %cst_80 : f32 to vector<8x128xf32>
    %216 = arith.mulf %215, %214 : vector<8x128xf32>
    %cst_81 = arith.constant 5.000000e-01 : f32
    %217 = vector.broadcast %cst_81 : f32 to vector<8x128xf32>
    %218 = arith.addf %216, %217 : vector<8x128xf32>
    %219 = vector.extract_strided_slice %210 {offsets = [0, 128], sizes = [8, 128], strides = [1, 1]} : vector<8x512xf32> to vector<8x128xf32>
    %cst_82 = arith.constant 5.000000e-01 : f32
    %220 = vector.broadcast %cst_82 : f32 to vector<8x128xf32>
    %221 = arith.mulf %220, %219 : vector<8x128xf32>
    %222 = math.tanh %221 : vector<8x128xf32>
    %cst_83 = arith.constant 5.000000e-01 : f32
    %223 = vector.broadcast %cst_83 : f32 to vector<8x128xf32>
    %224 = arith.mulf %223, %222 : vector<8x128xf32>
    %cst_84 = arith.constant 5.000000e-01 : f32
    %225 = vector.broadcast %cst_84 : f32 to vector<8x128xf32>
    %226 = arith.addf %224, %225 : vector<8x128xf32>
    %227 = vector.extract_strided_slice %210 {offsets = [0, 256], sizes = [8, 128], strides = [1, 1]} : vector<8x512xf32> to vector<8x128xf32>
    %228 = math.tanh %227 : vector<8x128xf32>
    %229 = vector.extract_strided_slice %210 {offsets = [0, 384], sizes = [8, 128], strides = [1, 1]} : vector<8x512xf32> to vector<8x128xf32>
    %cst_85 = arith.constant 5.000000e-01 : f32
    %230 = vector.broadcast %cst_85 : f32 to vector<8x128xf32>
    %231 = arith.mulf %230, %229 : vector<8x128xf32>
    %232 = math.tanh %231 : vector<8x128xf32>
    %cst_86 = arith.constant 5.000000e-01 : f32
    %233 = vector.broadcast %cst_86 : f32 to vector<8x128xf32>
    %234 = arith.mulf %233, %232 : vector<8x128xf32>
    %cst_87 = arith.constant 5.000000e-01 : f32
    %235 = vector.broadcast %cst_87 : f32 to vector<8x128xf32>
    %236 = arith.addf %234, %235 : vector<8x128xf32>
    %237 = arith.mulf %226, %199 : vector<8x128xf32>
    %238 = arith.mulf %218, %228 : vector<8x128xf32>
    %239 = arith.addf %237, %238 : vector<8x128xf32>
    %240 = math.tanh %239 : vector<8x128xf32>
    %241 = arith.mulf %236, %240 : vector<8x128xf32>
    %242 = arith.index_cast %c5_i32 : i32 to index
    %c0_88 = arith.constant 0 : index
    %c0_89 = arith.constant 0 : index
    %243 = vector.load %arg4[%242, %c0_88, %c0_89] : memref<8x8x128xf32, #tpu.memory_space<vmem>>, vector<1x8x128xf32>
    %244 = vector.shape_cast %243 : vector<1x8x128xf32> to vector<8x128xf32>
    %245 = vector.shape_cast %241 : vector<8x128xf32> to vector<1x8x128xf32>
    tpu.vector_store %arg4[%242, %c0_88, %c0_89], %245 {strides = array<i32>} : memref<8x8x128xf32, #tpu.memory_space<vmem>>, vector<1x8x128xf32>,
    %c6_i32 = arith.constant 6 : i32
    %cst_90 = arith.constant dense<0.000000e+00> : vector<8x512xf32>
    %246 = tpu.matmul %241, %3, %cst_90 {dimension_numbers = #tpu.dot_dimension_numbers<[1], [0], [0], [1], [0, 0, 1, 1], [], []>} : vector<8x128xf32>, vector<128x512xf32>, vector<8x512xf32> -> vector<8x512xf32>
    %247 = arith.index_cast %c6_i32 : i32 to index
    %c0_91 = arith.constant 0 : index
    %c0_92 = arith.constant 0 : index
    %248 = vector.load %arg2[%247, %c0_91, %c0_92] : memref<8x8x512xf32, #tpu.memory_space<vmem>>, vector<1x8x512xf32>
    %249 = vector.shape_cast %248 : vector<1x8x512xf32> to vector<8x512xf32>
    %250 = arith.addf %246, %249 : vector<8x512xf32>
    %251 = vector.extract_strided_slice %250 {offsets = [0, 0], sizes = [8, 128], strides = [1, 1]} : vector<8x512xf32> to vector<8x128xf32>
    %cst_93 = arith.constant 5.000000e-01 : f32
    %252 = vector.broadcast %cst_93 : f32 to vector<8x128xf32>
    %253 = arith.mulf %252, %251 : vector<8x128xf32>
    %254 = math.tanh %253 : vector<8x128xf32>
    %cst_94 = arith.constant 5.000000e-01 : f32
    %255 = vector.broadcast %cst_94 : f32 to vector<8x128xf32>
    %256 = arith.mulf %255, %254 : vector<8x128xf32>
    %cst_95 = arith.constant 5.000000e-01 : f32
    %257 = vector.broadcast %cst_95 : f32 to vector<8x128xf32>
    %258 = arith.addf %256, %257 : vector<8x128xf32>
    %259 = vector.extract_strided_slice %250 {offsets = [0, 128], sizes = [8, 128], strides = [1, 1]} : vector<8x512xf32> to vector<8x128xf32>
    %cst_96 = arith.constant 5.000000e-01 : f32
    %260 = vector.broadcast %cst_96 : f32 to vector<8x128xf32>
    %261 = arith.mulf %260, %259 : vector<8x128xf32>
    %262 = math.tanh %261 : vector<8x128xf32>
    %cst_97 = arith.constant 5.000000e-01 : f32
    %263 = vector.broadcast %cst_97 : f32 to vector<8x128xf32>
    %264 = arith.mulf %263, %262 : vector<8x128xf32>
    %cst_98 = arith.constant 5.000000e-01 : f32
    %265 = vector.broadcast %cst_98 : f32 to vector<8x128xf32>
    %266 = arith.addf %264, %265 : vector<8x128xf32>
    %267 = vector.extract_strided_slice %250 {offsets = [0, 256], sizes = [8, 128], strides = [1, 1]} : vector<8x512xf32> to vector<8x128xf32>
    %268 = math.tanh %267 : vector<8x128xf32>
    %269 = vector.extract_strided_slice %250 {offsets = [0, 384], sizes = [8, 128], strides = [1, 1]} : vector<8x512xf32> to vector<8x128xf32>
    %cst_99 = arith.constant 5.000000e-01 : f32
    %270 = vector.broadcast %cst_99 : f32 to vector<8x128xf32>
    %271 = arith.mulf %270, %269 : vector<8x128xf32>
    %272 = math.tanh %271 : vector<8x128xf32>
    %cst_100 = arith.constant 5.000000e-01 : f32
    %273 = vector.broadcast %cst_100 : f32 to vector<8x128xf32>
    %274 = arith.mulf %273, %272 : vector<8x128xf32>
    %cst_101 = arith.constant 5.000000e-01 : f32
    %275 = vector.broadcast %cst_101 : f32 to vector<8x128xf32>
    %276 = arith.addf %274, %275 : vector<8x128xf32>
    %277 = arith.mulf %266, %239 : vector<8x128xf32>
    %278 = arith.mulf %258, %268 : vector<8x128xf32>
    %279 = arith.addf %277, %278 : vector<8x128xf32>
    %280 = math.tanh %279 : vector<8x128xf32>
    %281 = arith.mulf %276, %280 : vector<8x128xf32>
    %282 = arith.index_cast %c6_i32 : i32 to index
    %c0_102 = arith.constant 0 : index
    %c0_103 = arith.constant 0 : index
    %283 = vector.load %arg4[%282, %c0_102, %c0_103] : memref<8x8x128xf32, #tpu.memory_space<vmem>>, vector<1x8x128xf32>
    %284 = vector.shape_cast %283 : vector<1x8x128xf32> to vector<8x128xf32>
    %285 = vector.shape_cast %281 : vector<8x128xf32> to vector<1x8x128xf32>
    tpu.vector_store %arg4[%282, %c0_102, %c0_103], %285 {strides = array<i32>} : memref<8x8x128xf32, #tpu.memory_space<vmem>>, vector<1x8x128xf32>,
    %c7_i32 = arith.constant 7 : i32
    %cst_104 = arith.constant dense<0.000000e+00> : vector<8x512xf32>
    %286 = tpu.matmul %281, %3, %cst_104 {dimension_numbers = #tpu.dot_dimension_numbers<[1], [0], [0], [1], [0, 0, 1, 1], [], []>} : vector<8x128xf32>, vector<128x512xf32>, vector<8x512xf32> -> vector<8x512xf32>
    %287 = arith.index_cast %c7_i32 : i32 to index
    %c0_105 = arith.constant 0 : index
    %c0_106 = arith.constant 0 : index
    %288 = vector.load %arg2[%287, %c0_105, %c0_106] : memref<8x8x512xf32, #tpu.memory_space<vmem>>, vector<1x8x512xf32>
    %289 = vector.shape_cast %288 : vector<1x8x512xf32> to vector<8x512xf32>
    %290 = arith.addf %286, %289 : vector<8x512xf32>
    %291 = vector.extract_strided_slice %290 {offsets = [0, 0], sizes = [8, 128], strides = [1, 1]} : vector<8x512xf32> to vector<8x128xf32>
    %cst_107 = arith.constant 5.000000e-01 : f32
    %292 = vector.broadcast %cst_107 : f32 to vector<8x128xf32>
    %293 = arith.mulf %292, %291 : vector<8x128xf32>
    %294 = math.tanh %293 : vector<8x128xf32>
    %cst_108 = arith.constant 5.000000e-01 : f32
    %295 = vector.broadcast %cst_108 : f32 to vector<8x128xf32>
    %296 = arith.mulf %295, %294 : vector<8x128xf32>
    %cst_109 = arith.constant 5.000000e-01 : f32
    %297 = vector.broadcast %cst_109 : f32 to vector<8x128xf32>
    %298 = arith.addf %296, %297 : vector<8x128xf32>
    %299 = vector.extract_strided_slice %290 {offsets = [0, 128], sizes = [8, 128], strides = [1, 1]} : vector<8x512xf32> to vector<8x128xf32>
    %cst_110 = arith.constant 5.000000e-01 : f32
    %300 = vector.broadcast %cst_110 : f32 to vector<8x128xf32>
    %301 = arith.mulf %300, %299 : vector<8x128xf32>
    %302 = math.tanh %301 : vector<8x128xf32>
    %cst_111 = arith.constant 5.000000e-01 : f32
    %303 = vector.broadcast %cst_111 : f32 to vector<8x128xf32>
    %304 = arith.mulf %303, %302 : vector<8x128xf32>
    %cst_112 = arith.constant 5.000000e-01 : f32
    %305 = vector.broadcast %cst_112 : f32 to vector<8x128xf32>
    %306 = arith.addf %304, %305 : vector<8x128xf32>
    %307 = vector.extract_strided_slice %290 {offsets = [0, 256], sizes = [8, 128], strides = [1, 1]} : vector<8x512xf32> to vector<8x128xf32>
    %308 = math.tanh %307 : vector<8x128xf32>
    %309 = vector.extract_strided_slice %290 {offsets = [0, 384], sizes = [8, 128], strides = [1, 1]} : vector<8x512xf32> to vector<8x128xf32>
    %cst_113 = arith.constant 5.000000e-01 : f32
    %310 = vector.broadcast %cst_113 : f32 to vector<8x128xf32>
    %311 = arith.mulf %310, %309 : vector<8x128xf32>
    %312 = math.tanh %311 : vector<8x128xf32>
    %cst_114 = arith.constant 5.000000e-01 : f32
    %313 = vector.broadcast %cst_114 : f32 to vector<8x128xf32>
    %314 = arith.mulf %313, %312 : vector<8x128xf32>
    %cst_115 = arith.constant 5.000000e-01 : f32
    %315 = vector.broadcast %cst_115 : f32 to vector<8x128xf32>
    %316 = arith.addf %314, %315 : vector<8x128xf32>
    %317 = arith.mulf %306, %279 : vector<8x128xf32>
    %318 = arith.mulf %298, %308 : vector<8x128xf32>
    %319 = arith.addf %317, %318 : vector<8x128xf32>
    %320 = math.tanh %319 : vector<8x128xf32>
    %321 = arith.mulf %316, %320 : vector<8x128xf32>
    %322 = arith.index_cast %c7_i32 : i32 to index
    %c0_116 = arith.constant 0 : index
    %c0_117 = arith.constant 0 : index
    %323 = vector.load %arg4[%322, %c0_116, %c0_117] : memref<8x8x128xf32, #tpu.memory_space<vmem>>, vector<1x8x128xf32>
    %324 = vector.shape_cast %323 : vector<1x8x128xf32> to vector<8x128xf32>
    %325 = vector.shape_cast %321 : vector<8x128xf32> to vector<1x8x128xf32>
    tpu.vector_store %arg4[%322, %c0_116, %c0_117], %325 {strides = array<i32>} : memref<8x8x128xf32, #tpu.memory_space<vmem>>, vector<1x8x128xf32>,
    %c8_i32 = arith.constant 8 : i32
    %c0_118 = arith.constant 0 : index
    %c0_119 = arith.constant 0 : index
    %326 = vector.load %arg7[%c0_118, %c0_119] : memref<8x128xf32, #tpu.memory_space<vmem>>, vector<8x128xf32>
    tpu.vector_store %arg7[%c0_118, %c0_119], %321 {strides = array<i32>} : memref<8x128xf32, #tpu.memory_space<vmem>>, vector<8x128xf32>,
    %c0_120 = arith.constant 0 : index
    %c0_121 = arith.constant 0 : index
    %327 = vector.load %arg8[%c0_120, %c0_121] : memref<8x128xf32, #tpu.memory_space<vmem>>, vector<8x128xf32>
    tpu.vector_store %arg8[%c0_120, %c0_121], %319 {strides = array<i32>} : memref<8x128xf32, #tpu.memory_space<vmem>>, vector<8x128xf32>,
    %c0_i32_122 = arith.constant 0 : i32
    %328 = arith.cmpi eq, %arg1, %c0_i32_122 : i32
    %329 = arith.extui %328 : i1 to i32
    %c0_i32_123 = arith.constant 0 : i32
    %330 = arith.cmpi ne, %329, %c0_i32_123 : i32
    scf.if %330 {
      %c0_124 = arith.constant 0 : index
      %c0_125 = arith.constant 0 : index
      %331 = vector.load %arg5[%c0_124, %c0_125] : memref<8x128xf32, #tpu.memory_space<vmem>>, vector<8x128xf32>
      tpu.vector_store %arg5[%c0_124, %c0_125], %321 {strides = array<i32>} : memref<8x128xf32, #tpu.memory_space<vmem>>, vector<8x128xf32>,
      %c0_126 = arith.constant 0 : index
      %c0_127 = arith.constant 0 : index
      %332 = vector.load %arg6[%c0_126, %c0_127] : memref<8x128xf32, #tpu.memory_space<vmem>>, vector<8x128xf32>
      tpu.vector_store %arg6[%c0_126, %c0_127], %319 {strides = array<i32>} : memref<8x128xf32, #tpu.memory_space<vmem>>, vector<8x128xf32>,
    } else {
    }
    return
  }
  func.func @transform_0(%arg0: i32, %arg1: i32) -> (i32, i32, i32) {
    %c0_i32 = arith.constant 0 : i32
    %c0_i32_0 = arith.constant 0 : i32
    return %arg1, %arg0, %c0_i32 : i32, i32, i32
  }
  func.func @transform_1(%arg0: i32, %arg1: i32) -> (i32, i32) {
    %c0_i32 = arith.constant 0 : i32
    %c0_i32_0 = arith.constant 0 : i32
    %c0_i32_1 = arith.constant 0 : i32
    return %c0_i32, %c0_i32_0 : i32, i32
  }
  func.func @transform_2(%arg0: i32, %arg1: i32) -> (i32, i32, i32) {
    %c0_i32 = arith.constant 0 : i32
    %c0_i32_0 = arith.constant 0 : i32
    return %arg1, %arg0, %c0_i32 : i32, i32, i32
  }
  func.func @transform_3(%arg0: i32, %arg1: i32) -> (i32, i32) {
    %c0_i32 = arith.constant 0 : i32
    %c0_i32_0 = arith.constant 0 : i32
    return %arg0, %c0_i32 : i32, i32
  }
  func.func @transform_4(%arg0: i32, %arg1: i32) -> (i32, i32) {
    %c0_i32 = arith.constant 0 : i32
    %c0_i32_0 = arith.constant 0 : i32
    return %arg0, %c0_i32 : i32, i32
  }
}

</mosaic_0001>

<bundles_post_ra>
// kernel: custom_lstm_forward.1
= control target key start
LH: loop header
LB: loop body
LE: loop exit
PB: predicated region body
PF: predicated region fallthrough
CT: control target
= control target key end

     0   :  { %v1123_v63 = vmov 0.0   ;;  %s2447_s1 = inlined_call_operand.vmem [shape: f32[128,512], index: 1, kind: input, shape index: {}]   ;;  %s2448_s0 = inlined_call_operand.vmem [shape: f32[8,8,512], index: 0, kind: input, shape index: {}]   ;;  %s2449_s2 = inlined_call_operand.vmem [shape: f32[8,8,128], index: 2, kind: output, shape index: {0}]   ;;  %s2450_s4 = inlined_call_operand.vmem [shape: f32[8,128], index: 4, kind: output, shape index: {2}]   ;;  %s2451_s3 = inlined_call_operand.vmem [shape: f32[8,128], index: 3, kind: output, shape index: {1}]  }
   0x1   :  { %v1152_v0 = vld [vmem:[%s2447_s1 + $0x1e0] sm:$0xff]  ;;  %v1157_v1 = vld [vmem:[%s2447_s1 + $0x1e8] sm:$0xff]  ;;  %v1162_v2 = vld [vmem:[%s2447_s1 + $0x1f0] sm:$0xff] }
   0x2   :  { %90 = vmatpush.msra.mxu0 %v1152_v0  ;;  %110 = vmatpush.msra.mxu1 %v1157_v1  ;;  %v1169_v3 = vld [vmem:[%s2447_s1 + $0x1c0] sm:$0xff]  ;;  %v1174_v4 = vld [vmem:[%s2447_s1 + $0x1c8] sm:$0xff]  ;;  %v1179_v5 = vld [vmem:[%s2447_s1 + $0x1d0] sm:$0xff] }
   0x3   :  { %130 = vmatpush.msra.mxu2 %v1162_v2  ;;  %v1185_v6 = vld [vmem:[%s2447_s1 + $0x1a0] sm:$0xff]  ;;  %v1190_v7 = vld [vmem:[%s2447_s1 + $0x1a8] sm:$0xff]  ;;  %v1197_v8 = vld [vmem:[%s2447_s1 + $0x1b0] sm:$0xff] }
   0x4   :  { %91 = vmatpush.msra.mxu0 %v1169_v3  ;;  %111 = vmatpush.msra.mxu1 %v1174_v4  ;;  %v1202_v9 = vld [vmem:[%s2447_s1 + $0x1f8] sm:$0xff]  ;;  %v1209_v10 = vld [vmem:[%s2447_s1 + $0x180] sm:$0xff]  ;;  %v1214_v11 = vld [vmem:[%s2447_s1 + $0x188] sm:$0xff] }
   0x5   :  { %131 = vmatpush.msra.mxu2 %v1179_v5  ;;  %150 = vmatpush.msra.mxu3 %v1202_v9  ;;  %v1219_v12 = vld [vmem:[%s2447_s1 + $0x1d8] sm:$0xff]  ;;  %v1226_v13 = vld [vmem:[%s2447_s1 + $0x190] sm:$0xff]  ;;  %v1238_v15 = vld [vmem:[%s2447_s1 + $0x160] sm:$0xff] }
   0x6   :  { %92 = vmatpush.msra.mxu0 %v1185_v6  ;;  %112 = vmatpush.msra.mxu1 %v1190_v7  ;;  %v1231_v14 = vld [vmem:[%s2447_s1 + $0x1b8] sm:$0xff]  ;;  %v1243_v16 = vld [vmem:[%s2447_s1 + $0x168] sm:$0xff]  ;;  %v1250_v17 = vld [vmem:[%s2447_s1 + $0x170] sm:$0xff] }
   0x7   :  { %132 = vmatpush.msra.mxu2 %v1197_v8  ;;  %151 = vmatpush.msra.mxu3 %v1219_v12  ;;  %v1255_v18 = vld [vmem:[%s2447_s1 + $0x198] sm:$0xff]  ;;  %v1262_v19 = vld [vmem:[%s2447_s1 + $0x140] sm:$0xff]  ;;  %v1267_v20 = vld [vmem:[%s2447_s1 + $0x148] sm:$0xff] }
   0x8   :  { %93 = vmatpush.msra.mxu0 %v1209_v10  ;;  %113 = vmatpush.msra.mxu1 %v1214_v11  ;;  %v1274_v21 = vld [vmem:[%s2447_s1 + $0x150] sm:$0xff]  ;;  %v1279_v22 = vld [vmem:[%s2447_s1 + $0x178] sm:$0xff]  ;;  %v1286_v23 = vld [vmem:[%s2447_s1 + $0x120] sm:$0xff] }
   0x9   :  { %133 = vmatpush.msra.mxu2 %v1226_v13  ;;  %152 = vmatpush.msra.mxu3 %v1231_v14  ;;  %v1291_v24 = vld [vmem:[%s2447_s1 + $0x128] sm:$0xff]  ;;  %v1298_v25 = vld [vmem:[%s2447_s1 + $0x130] sm:$0xff]  ;;  %v1303_v26 = vld [vmem:[%s2447_s1 + $0x158] sm:$0xff] }
   0xa   :  { %94 = vmatpush.msra.mxu0 %v1238_v15  ;;  %114 = vmatpush.msra.mxu1 %v1243_v16  ;;  %v1310_v27 = vld [vmem:[%s2447_s1 + $0x100] sm:$0xff]  ;;  %v1315_v28 = vld [vmem:[%s2447_s1 + $0x108] sm:$0xff]  ;;  %v1322_v29 = vld [vmem:[%s2447_s1 + $0x110] sm:$0xff] }
   0xb   :  { %134 = vmatpush.msra.mxu2 %v1250_v17  ;;  %153 = vmatpush.msra.mxu3 %v1255_v18  ;;  %v1327_v30 = vld [vmem:[%s2447_s1 + $0x138] sm:$0xff]  ;;  %v1334_v31 = vld [vmem:[%s2447_s1 + $0xe0] sm:$0xff]  ;;  %v1339_v32 = vld [vmem:[%s2447_s1 + $0xe8] sm:$0xff] }
   0xc   :  { %95 = vmatpush.msra.mxu0 %v1262_v19  ;;  %115 = vmatpush.msra.mxu1 %v1267_v20  ;;  %v1346_v33 = vld [vmem:[%s2447_s1 + $0xf0] sm:$0xff]  ;;  %v1351_v34 = vld [vmem:[%s2447_s1 + $0x118] sm:$0xff]  ;;  %v1358_v35 = vld [vmem:[%s2447_s1 + $0xc0] sm:$0xff] }
   0xd   :  { %135 = vmatpush.msra.mxu2 %v1274_v21  ;;  %154 = vmatpush.msra.mxu3 %v1279_v22  ;;  %v1363_v36 = vld [vmem:[%s2447_s1 + $0xc8] sm:$0xff]  ;;  %v1370_v37 = vld [vmem:[%s2447_s1 + $0xd0] sm:$0xff]  ;;  %v1375_v38 = vld [vmem:[%s2447_s1 + $0xf8] sm:$0xff] }
   0xe   :  { %96 = vmatpush.msra.mxu0 %v1286_v23  ;;  %116 = vmatpush.msra.mxu1 %v1291_v24  ;;  %v1382_v39 = vld [vmem:[%s2447_s1 + $0xa0] sm:$0xff]  ;;  %v1387_v40 = vld [vmem:[%s2447_s1 + $0xa8] sm:$0xff]  ;;  %v1394_v41 = vld [vmem:[%s2447_s1 + $0xb0] sm:$0xff] }
   0xf   :  { %136 = vmatpush.msra.mxu2 %v1298_v25  ;;  %155 = vmatpush.msra.mxu3 %v1303_v26  ;;  %v1399_v42 = vld [vmem:[%s2447_s1 + $0xd8] sm:$0xff]  ;;  %v1406_v43 = vld [vmem:[%s2447_s1 + $0x80] sm:$0xff]  ;;  %v1411_v44 = vld [vmem:[%s2447_s1 + $0x88] sm:$0xff] }
  0x10   :  { %97 = vmatpush.msra.mxu0 %v1310_v27  ;;  %117 = vmatpush.msra.mxu1 %v1315_v28  ;;  %2513 = vst [vmem:[#allocation4_spill] sm:$0xff] %v1406_v43  ;;  %v1418_v45 = vld [vmem:[%s2447_s1 + $0x90] sm:$0xff]  ;;  %v1423_v46 = vld [vmem:[%s2447_s1 + $0xb8] sm:$0xff]  ;;  %v1430_v47 = vld [vmem:[%s2447_s1 + $0x60] sm:$0xff] }
  0x11   :  { %137 = vmatpush.msra.mxu2 %v1322_v29  ;;  %156 = vmatpush.msra.mxu3 %v1327_v30  ;;  %2514 = vst [vmem:[#allocation5_spill] sm:$0xff] %v1411_v44  ;;  %v1435_v48 = vld [vmem:[%s2447_s1 + $0x68] sm:$0xff]  ;;  %v1442_v49 = vld [vmem:[%s2447_s1 + $0x70] sm:$0xff]  ;;  %v1447_v50 = vld [vmem:[%s2447_s1 + $0x98] sm:$0xff] }
  0x12   :  { %98 = vmatpush.msra.mxu0 %v1334_v31  ;;  %118 = vmatpush.msra.mxu1 %v1339_v32  ;;  %2515 = vst [vmem:[#allocation6_spill] sm:$0xff] %v1418_v45  ;;  %v1454_v51 = vld [vmem:[%s2447_s1 + $0x40] sm:$0xff]  ;;  %v1459_v52 = vld [vmem:[%s2447_s1 + $0x48] sm:$0xff]  ;;  %v1466_v53 = vld [vmem:[%s2447_s1 + $0x50] sm:$0xff] }
  0x13   :  { %138 = vmatpush.msra.mxu2 %v1346_v33  ;;  %157 = vmatpush.msra.mxu3 %v1351_v34  ;;  %2516 = vst [vmem:[#allocation7_spill] sm:$0xff] %v1430_v47  ;;  %v1471_v54 = vld [vmem:[%s2447_s1 + $0x78] sm:$0xff]  ;;  %v1478_v55 = vld [vmem:[%s2447_s1 + $0x20] sm:$0xff]  ;;  %v1483_v56 = vld [vmem:[%s2447_s1 + $0x28] sm:$0xff] }
  0x14   :  { %99 = vmatpush.msra.mxu0 %v1358_v35  ;;  %119 = vmatpush.msra.mxu1 %v1363_v36  ;;  %2517 = vst [vmem:[#allocation8_spill] sm:$0xff] %v1435_v48  ;;  %v1490_v57 = vld [vmem:[%s2447_s1 + $0x30] sm:$0xff]  ;;  %v1495_v58 = vld [vmem:[%s2447_s1 + $0x58] sm:$0xff]  ;;  %v1502_v59 = vld [vmem:[%s2447_s1] sm:$0xff] }
  0x15   :  { %139 = vmatpush.msra.mxu2 %v1370_v37  ;;  %158 = vmatpush.msra.mxu3 %v1375_v38  ;;  %2518 = vst [vmem:[#allocation9_spill] sm:$0xff] %v1442_v49  ;;  %v1507_v60 = vld [vmem:[%s2447_s1 + $0x8] sm:$0xff]  ;;  %v1514_v61 = vld [vmem:[%s2447_s1 + $0x10] sm:$0xff]  ;;  %v1523_v62 = vld [vmem:[%s2447_s1 + $0x38] sm:$0xff] }
  0x16   :  { %100 = vmatpush.msra.mxu0 %v1382_v39  ;;  %120 = vmatpush.msra.mxu1 %v1387_v40  ;;  %2519 = vst [vmem:[#allocation10_spill] sm:$0xff] %v1447_v50 }
  0x17   :  { %140 = vmatpush.msra.mxu2 %v1394_v41  ;;  %159 = vmatpush.msra.mxu3 %v1399_v42  ;;  %2520 = vst [vmem:[#allocation11_spill] sm:$0xff] %v1454_v51 }
  0x18   :  { %101 = vmatpush.msra.mxu0 %v1406_v43  ;;  %121 = vmatpush.msra.mxu1 %v1411_v44  ;;  %2521 = vst [vmem:[#allocation12_spill] sm:$0xff] %v1459_v52 }
  0x19   :  { %141 = vmatpush.msra.mxu2 %v1418_v45  ;;  %160 = vmatpush.msra.mxu3 %v1423_v46  ;;  %2522 = vst [vmem:[#allocation13_spill] sm:$0xff] %v1466_v53 }
  0x1a   :  { %102 = vmatpush.msra.mxu0 %v1430_v47  ;;  %122 = vmatpush.msra.mxu1 %v1435_v48  ;;  %2523 = vst [vmem:[#allocation14_spill] sm:$0xff] %v1471_v54 }
  0x1b   :  { %142 = vmatpush.msra.mxu2 %v1442_v49  ;;  %161 = vmatpush.msra.mxu3 %v1447_v50  ;;  %2524 = vst [vmem:[#allocation15_spill] sm:$0xff] %v1478_v55 }
  0x1c   :  { %2525 = vst [vmem:[#allocation16_spill] sm:$0xff] %v1483_v56  ;;  %103 = vmatpush.msra.mxu0 %v1454_v51  ;;  %123 = vmatpush.msra.mxu1 %v1459_v52 }
  0x1d   :  { %2526 = vst [vmem:[#allocation17_spill] sm:$0xff] %v1490_v57  ;;  %143 = vmatpush.msra.mxu2 %v1466_v53  ;;  %162 = vmatpush.msra.mxu3 %v1471_v54 }
  0x1e   :  { %2527 = vst [vmem:[#allocation18_spill] sm:$0xff] %v1495_v58  ;;  %104 = vmatpush.msra.mxu0 %v1478_v55  ;;  %124 = vmatpush.msra.mxu1 %v1483_v56 }
  0x1f   :  { %2528 = vst [vmem:[#allocation19_spill] sm:$0xff] %v1502_v59  ;;  %144 = vmatpush.msra.mxu2 %v1490_v57  ;;  %163 = vmatpush.msra.mxu3 %v1495_v58  ;;  %v1529_v57 = vld [vmem:[%s2447_s1 + $0x18] sm:$0xff] }
  0x20   :  { %2529 = vst [vmem:[#allocation20_spill] sm:$0xff] %v1507_v60  ;;  %105 = vmatpush.msra.mxu0 %v1502_v59  ;;  %125 = vmatpush.msra.mxu1 %v1507_v60 }
  0x21   :  { %2530 = vst [vmem:[#allocation21_spill] sm:$0xff] %v1514_v61  ;;  %145 = vmatpush.msra.mxu2 %v1514_v61  ;;  %106 = vmatmul.f32.vlgmr.msra.gmra.mxu0 %v1123_v63 }
  0x22   :  { %2531 = vst [vmem:[#allocation22_spill] sm:$0xff] %v1523_v62  ;;  %126 = vmatmul.f32.vlgmr.msra.gmra.mxu1 %v1123_v63  ;;  %146 = vmatmul.f32.vlgmr.msra.gmra.mxu2 %v1123_v63 }
  0x23   :  { %2532 = vst [vmem:[#allocation23_spill] sm:$0xff] %v1529_v57  ;;  %164 = vmatpush.msra.mxu3 %v1523_v62  ;;  %194 = vmatpush.msrb.mxu0 %v1152_v0 }
  0x24   :  { %214 = vmatpush.msrb.mxu1 %v1157_v1  ;;  %234 = vmatpush.msrb.mxu2 %v1162_v2 }
  0x25   :  { %165 = vmatpush.msra.mxu3 %v1529_v57  ;;  %195 = vmatpush.msrb.mxu0 %v1169_v3 }
  0x26   :  { %166 = vmatmul.f32.vlgmr.msra.gmra.mxu3 %v1123_v63  ;;  %215 = vmatpush.msrb.mxu1 %v1174_v4  ;;  %v2533_v63 = vld [vmem:[#allocation17_spill] sm:$0xff] }
  0x27   :  { %254 = vmatpush.msrb.mxu3 %v1202_v9  ;;  %235 = vmatpush.msrb.mxu2 %v1179_v5 }
  0x28   :  { %196 = vmatpush.msrb.mxu0 %v1185_v6  ;;  %216 = vmatpush.msrb.mxu1 %v1190_v7 }
  0x29   :  { %255 = vmatpush.msrb.mxu3 %v1219_v12  ;;  %236 = vmatpush.msrb.mxu2 %v1197_v8 }
  0x2a   :  { %197 = vmatpush.msrb.mxu0 %v1209_v10  ;;  %217 = vmatpush.msrb.mxu1 %v1214_v11 }
  0x2b   :  { %256 = vmatpush.msrb.mxu3 %v1231_v14  ;;  %237 = vmatpush.msrb.mxu2 %v1226_v13 }
  0x2c   :  { %198 = vmatpush.msrb.mxu0 %v1238_v15  ;;  %218 = vmatpush.msrb.mxu1 %v1243_v16 }
  0x2d   :  { %257 = vmatpush.msrb.mxu3 %v1255_v18  ;;  %238 = vmatpush.msrb.mxu2 %v1250_v17 }
  0x2e   :  { %199 = vmatpush.msrb.mxu0 %v1262_v19  ;;  %219 = vmatpush.msrb.mxu1 %v1267_v20 }
  0x2f   :  { %258 = vmatpush.msrb.mxu3 %v1279_v22  ;;  %239 = vmatpush.msrb.mxu2 %v1274_v21 }
  0x30   :  { %200 = vmatpush.msrb.mxu0 %v1286_v23  ;;  %220 = vmatpush.msrb.mxu1 %v1291_v24 }
  0x31   :  { %259 = vmatpush.msrb.mxu3 %v1303_v26  ;;  %240 = vmatpush.msrb.mxu2 %v1298_v25 }
  0x32   :  { %201 = vmatpush.msrb.mxu0 %v1310_v27  ;;  %221 = vmatpush.msrb.mxu1 %v1315_v28 }
  0x33   :  { %260 = vmatpush.msrb.mxu3 %v1327_v30  ;;  %241 = vmatpush.msrb.mxu2 %v1322_v29 }
  0x34   :  { %202 = vmatpush.msrb.mxu0 %v1334_v31  ;;  %222 = vmatpush.msrb.mxu1 %v1339_v32 }
  0x35   :  { %261 = vmatpush.msrb.mxu3 %v1351_v34  ;;  %242 = vmatpush.msrb.mxu2 %v1346_v33 }
  0x36   :  { %203 = vmatpush.msrb.mxu0 %v1358_v35  ;;  %223 = vmatpush.msrb.mxu1 %v1363_v36 }
  0x37   :  { %262 = vmatpush.msrb.mxu3 %v1375_v38  ;;  %243 = vmatpush.msrb.mxu2 %v1370_v37 }
  0x38   :  { %204 = vmatpush.msrb.mxu0 %v1382_v39  ;;  %224 = vmatpush.msrb.mxu1 %v1387_v40 }
  0x39   :  { %263 = vmatpush.msrb.mxu3 %v1399_v42  ;;  %244 = vmatpush.msrb.mxu2 %v1394_v41 }
  0x3a   :  { %205 = vmatpush.msrb.mxu0 %v1406_v43  ;;  %225 = vmatpush.msrb.mxu1 %v1411_v44 }
  0x3b   :  { %264 = vmatpush.msrb.mxu3 %v1423_v46  ;;  %245 = vmatpush.msrb.mxu2 %v1418_v45 }
  0x3c   :  { %206 = vmatpush.msrb.mxu0 %v1430_v47  ;;  %226 = vmatpush.msrb.mxu1 %v1435_v48 }
  0x3d   :  { %265 = vmatpush.msrb.mxu3 %v1447_v50  ;;  %246 = vmatpush.msrb.mxu2 %v1442_v49 }
  0x3e   :  { %207 = vmatpush.msrb.mxu0 %v1454_v51  ;;  %227 = vmatpush.msrb.mxu1 %v1459_v52 }
  0x3f   :  { %266 = vmatpush.msrb.mxu3 %v1471_v54  ;;  %247 = vmatpush.msrb.mxu2 %v1466_v53 }
  0x40   :  { %208 = vmatpush.msrb.mxu0 %v1478_v55  ;;  %228 = vmatpush.msrb.mxu1 %v1483_v56 }
  0x41   :  { %267 = vmatpush.msrb.mxu3 %v1495_v58  ;;  %248 = vmatpush.msrb.mxu2 %v2533_v63 }
  0x42   :  { %209 = vmatpush.msrb.mxu0 %v1502_v59  ;;  %229 = vmatpush.msrb.mxu1 %v1507_v60 }
  0x43   :  { %268 = vmatpush.msrb.mxu3 %v1523_v62  ;;  %249 = vmatpush.msrb.mxu2 %v1514_v61 }
  0x44   :  { %299 = vmatpush.msra.mxu0 %v1152_v0  ;;  %319 = vmatpush.msra.mxu1 %v1157_v1 }
  0x45   :  { %269 = vmatpush.msrb.mxu3 %v1529_v57  ;;  %339 = vmatpush.msra.mxu2 %v1162_v2 }
  0x46   :  { %300 = vmatpush.msra.mxu0 %v1169_v3  ;;  %320 = vmatpush.msra.mxu1 %v1174_v4 }
  0x47   :  { %359 = vmatpush.msra.mxu3 %v1202_v9  ;;  %340 = vmatpush.msra.mxu2 %v1179_v5 }
  0x48   :  { %301 = vmatpush.msra.mxu0 %v1185_v6  ;;  %321 = vmatpush.msra.mxu1 %v1190_v7 }
  0x49   :  { %360 = vmatpush.msra.mxu3 %v1219_v12  ;;  %341 = vmatpush.msra.mxu2 %v1197_v8 }
  0x4a   :  { %302 = vmatpush.msra.mxu0 %v1209_v10  ;;  %322 = vmatpush.msra.mxu1 %v1214_v11 }
  0x4b   :  { %361 = vmatpush.msra.mxu3 %v1231_v14  ;;  %342 = vmatpush.msra.mxu2 %v1226_v13 }
  0x4c   :  { %303 = vmatpush.msra.mxu0 %v1238_v15  ;;  %323 = vmatpush.msra.mxu1 %v1243_v16 }
  0x4d   :  { %362 = vmatpush.msra.mxu3 %v1255_v18  ;;  %343 = vmatpush.msra.mxu2 %v1250_v17 }
  0x4e   :  { %304 = vmatpush.msra.mxu0 %v1262_v19  ;;  %324 = vmatpush.msra.mxu1 %v1267_v20 }
  0x4f   :  { %363 = vmatpush.msra.mxu3 %v1279_v22  ;;  %344 = vmatpush.msra.mxu2 %v1274_v21 }
  0x50   :  { %305 = vmatpush.msra.mxu0 %v1286_v23  ;;  %325 = vmatpush.msra.mxu1 %v1291_v24 }
  0x51   :  { %364 = vmatpush.msra.mxu3 %v1303_v26  ;;  %345 = vmatpush.msra.mxu2 %v1298_v25 }
  0x52   :  { %306 = vmatpush.msra.mxu0 %v1310_v27  ;;  %326 = vmatpush.msra.mxu1 %v1315_v28 }
  0x53   :  { %365 = vmatpush.msra.mxu3 %v1327_v30  ;;  %346 = vmatpush.msra.mxu2 %v1322_v29 }
  0x54   :  { %307 = vmatpush.msra.mxu0 %v1334_v31  ;;  %327 = vmatpush.msra.mxu1 %v1339_v32 }
  0x55   :  { %366 = vmatpush.msra.mxu3 %v1351_v34  ;;  %347 = vmatpush.msra.mxu2 %v1346_v33 }
  0x56   :  { %308 = vmatpush.msra.mxu0 %v1358_v35  ;;  %328 = vmatpush.msra.mxu1 %v1363_v36 }
  0x57   :  { %367 = vmatpush.msra.mxu3 %v1375_v38  ;;  %348 = vmatpush.msra.mxu2 %v1370_v37 }
  0x58   :  { %309 = vmatpush.msra.mxu0 %v1382_v39  ;;  %329 = vmatpush.msra.mxu1 %v1387_v40 }
  0x59   :  { %368 = vmatpush.msra.mxu3 %v1399_v42  ;;  %349 = vmatpush.msra.mxu2 %v1394_v41 }
  0x5a   :  { %310 = vmatpush.msra.mxu0 %v1406_v43  ;;  %330 = vmatpush.msra.mxu1 %v1411_v44 }
  0x5b   :  { %369 = vmatpush.msra.mxu3 %v1423_v46  ;;  %350 = vmatpush.msra.mxu2 %v1418_v45 }
  0x5c   :  { %311 = vmatpush.msra.mxu0 %v1430_v47  ;;  %331 = vmatpush.msra.mxu1 %v1435_v48 }
  0x5d   :  { %370 = vmatpush.msra.mxu3 %v1447_v50  ;;  %351 = vmatpush.msra.mxu2 %v1442_v49 }
  0x5e   :  { %312 = vmatpush.msra.mxu0 %v1454_v51  ;;  %332 = vmatpush.msra.mxu1 %v1459_v52  ;;  %v89_v51 = vld [vmem:[%s2448_s0 + $0x18] sm:$0xff] }
  0x5f   :  { %371 = vmatpush.msra.mxu3 %v1471_v54  ;;  %352 = vmatpush.msra.mxu2 %v1466_v53 }
  0x60   :  { %313 = vmatpush.msra.mxu0 %v1478_v55  ;;  %333 = vmatpush.msra.mxu1 %v1483_v56  ;;  %v87_v56 = vld [vmem:[%s2448_s0 + $0x8] sm:$0xff] }
  0x61   :  { %372 = vmatpush.msra.mxu3 %v1495_v58  ;;  %353 = vmatpush.msra.mxu2 %v2533_v63  ;;  %v86_v58 = vld [vmem:[%s2448_s0] sm:$0xff] }
  0x62   :  { %314 = vmatpush.msra.mxu0 %v1502_v59  ;;  %334 = vmatpush.msra.mxu1 %v1507_v60 }
  0x63   :  { %373 = vmatpush.msra.mxu3 %v1523_v62  ;;  %354 = vmatpush.msra.mxu2 %v1514_v61  ;;  %v88_v61 = vld [vmem:[%s2448_s0 + $0x10] sm:$0xff] }
  0x65   :  { %374 = vmatpush.msra.mxu3 %v1529_v57 }
  0x9e   :  { %v107_v55 = vpop.f32.mrf.mxu0 }
  0x9f   :  { %v108_v63 = vadd.f32 %v107_v55, %v86_v58  ;;  %v127_v53 = vpop.f32.mrf.mxu1 }
  0xa0   :  { %v128_v62 = vadd.f32 %v127_v53, %v87_v56 }
  0xa1   :  { %v170_v52 = vmul.f32 0.5, %v108_v63 }
  0xa2   :  { %v174_v59 = vmul.f32 0.5, %v128_v62 }
  0xa3   :  { %979 = vtanh.f32 %v170_v52 }
  0xa4   :  { %981 = vtanh.f32 %v174_v59 }
  0xa5   :  { %v147_v57 = vpop.f32.mrf.mxu2 }
  0xa6   :  { %v148_v60 = vadd.f32 %v147_v57, %v88_v61 }
  0xa8   :  { %983 = vtanh.f32 %v148_v60 }
  0xa9   :  { %v980_v54 = vpop.eup %979  ;;  %v167_v49 = vpop.f32.mrf.mxu3 }
  0xaa   :  { %v982_v55 = vpop.eup %981  ;;  %v172_v58 = vmul.f32 0.5, %v980_v54  ;;  %v168_v53 = vadd.f32 %v167_v49, %v89_v51  ;;  %v2538_v49 = vld [vmem:[#allocation8_spill] sm:$0xff]  ;;  %v2539_v51 = vld [vmem:[#allocation9_spill] sm:$0xff]  ;;  %v2540_v54 = vld [vmem:[#allocation14_spill] sm:$0xff] }
  0xab   :  { %v176_v56 = vmul.f32 0.5, %v982_v55  ;;  %v2541_v55 = vld [vmem:[#allocation11_spill] sm:$0xff] }
  0xac   :  { %v173_v62 = vadd.f32 0.5, %v172_v58  ;;  %v179_v52 = vmul.f32 0.5, %v168_v53  ;;  %v2542_v58 = vld [vmem:[#allocation12_spill] sm:$0xff]  ;;  %v2543_v53 = vld [vmem:[#allocation13_spill] sm:$0xff] }
  0xad   :  { %v177_v63 = vadd.f32 0.5, %v176_v56  ;;  %v2544_v56 = vld [vmem:[#allocation18_spill] sm:$0xff] }
  0xae   :  { %v984_v48 = vpop.eup %983  ;;  %985 = vtanh.f32 %v179_v52  ;;  %v2546_v52 = vld [vmem:[#allocation16_spill] sm:$0xff] }
  0xaf   :  { %v183_v47 = vmul.f32 0.0, %v177_v63  ;;  %v184_v59 = vmul.f32 %v984_v48, %v173_v62  ;;  %v2537_v48 = vld [vmem:[#allocation7_spill] sm:$0xff]  ;;  %v2547_v63 = vld [vmem:[#allocation17_spill] sm:$0xff] }
  0xb0   :  { %v2545_v62 = vld [vmem:[#allocation15_spill] sm:$0xff] }
  0xb1   :  { %v1673_v50 = vadd.f32 %v184_v59, %v183_v47  ;;  %v2536_v47 = vld [vmem:[#allocation10_spill] sm:$0xff] }
  0xb2   :  { %v2548_v59 = vld [vmem:[#allocation22_spill] sm:$0xff] }
  0xb3   :  { %987 = vtanh.f32 %v1673_v50 }
  0xb4   :  { %v986_v57 = vpop.eup %985 }
  0xb5   :  { %v181_v61 = vmul.f32 0.5, %v986_v57  ;;  %v2549_v57 = vld [vmem:[#allocation19_spill] sm:$0xff] }
  0xb7   :  { %v182_v60 = vadd.f32 0.5, %v181_v61  ;;  %v2550_v61 = vld [vmem:[#allocation20_spill] sm:$0xff] }
  0xb9   :  { %v988_v45 = vpop.eup %987 }
  0xba   :  { %v187_v44 = vmul.f32 %v988_v45, %v182_v60  ;;  %v2535_v45 = vld [vmem:[#allocation6_spill] sm:$0xff]  ;;  %v2551_v60 = vld [vmem:[#allocation21_spill] sm:$0xff] }
  0xbc   :  { %188 = vst [vmem:[%s2449_s2] sm:$0xff] %v187_v44  ;;  %210 = vmatmul.f32.vlgmr.msrb.gmra.mxu0 %v187_v44  ;;  %230 = vmatmul.f32.vlgmr.msrb.gmra.mxu1 %v187_v44 }
  0xbd   :  { %250 = vmatmul.f32.vlgmr.msrb.gmra.mxu2 %v187_v44  ;;  %270 = vmatmul.f32.vlgmr.msrb.gmra.mxu3 %v187_v44  ;;  %v2534_v44 = vld [vmem:[#allocation5_spill] sm:$0xff] }
  0xbe   :  { %404 = vmatpush.msrb.mxu0 %v1152_v0  ;;  %424 = vmatpush.msrb.mxu1 %v1157_v1 }
  0xbf   :  { %444 = vmatpush.msrb.mxu2 %v1162_v2  ;;  %464 = vmatpush.msrb.mxu3 %v1202_v9 }
  0xc0   :  { %405 = vmatpush.msrb.mxu0 %v1169_v3  ;;  %425 = vmatpush.msrb.mxu1 %v1174_v4 }
  0xc1   :  { %445 = vmatpush.msrb.mxu2 %v1179_v5  ;;  %465 = vmatpush.msrb.mxu3 %v1219_v12 }
  0xc2   :  { %406 = vmatpush.msrb.mxu0 %v1185_v6  ;;  %426 = vmatpush.msrb.mxu1 %v1190_v7 }
  0xc3   :  { %446 = vmatpush.msrb.mxu2 %v1197_v8  ;;  %466 = vmatpush.msrb.mxu3 %v1231_v14 }
  0xc4   :  { %407 = vmatpush.msrb.mxu0 %v1209_v10  ;;  %427 = vmatpush.msrb.mxu1 %v1214_v11 }
  0xc5   :  { %447 = vmatpush.msrb.mxu2 %v1226_v13  ;;  %467 = vmatpush.msrb.mxu3 %v1255_v18 }
  0xc6   :  { %408 = vmatpush.msrb.mxu0 %v1238_v15  ;;  %428 = vmatpush.msrb.mxu1 %v1243_v16 }
  0xc7   :  { %448 = vmatpush.msrb.mxu2 %v1250_v17  ;;  %468 = vmatpush.msrb.mxu3 %v1279_v22 }
  0xc8   :  { %409 = vmatpush.msrb.mxu0 %v1262_v19  ;;  %429 = vmatpush.msrb.mxu1 %v1267_v20 }
  0xc9   :  { %449 = vmatpush.msrb.mxu2 %v1274_v21  ;;  %469 = vmatpush.msrb.mxu3 %v1303_v26 }
  0xca   :  { %410 = vmatpush.msrb.mxu0 %v1286_v23  ;;  %430 = vmatpush.msrb.mxu1 %v1291_v24 }
  0xcb   :  { %450 = vmatpush.msrb.mxu2 %v1298_v25  ;;  %470 = vmatpush.msrb.mxu3 %v1327_v30 }
  0xcc   :  { %411 = vmatpush.msrb.mxu0 %v1310_v27  ;;  %431 = vmatpush.msrb.mxu1 %v1315_v28 }
  0xcd   :  { %451 = vmatpush.msrb.mxu2 %v1322_v29  ;;  %471 = vmatpush.msrb.mxu3 %v1351_v34 }
  0xce   :  { %412 = vmatpush.msrb.mxu0 %v1334_v31  ;;  %432 = vmatpush.msrb.mxu1 %v1339_v32 }
  0xcf   :  { %452 = vmatpush.msrb.mxu2 %v1346_v33  ;;  %472 = vmatpush.msrb.mxu3 %v1375_v38 }
  0xd0   :  { %413 = vmatpush.msrb.mxu0 %v1358_v35  ;;  %433 = vmatpush.msrb.mxu1 %v1363_v36 }
  0xd1   :  { %453 = vmatpush.msrb.mxu2 %v1370_v37  ;;  %473 = vmatpush.msrb.mxu3 %v1399_v42 }
  0xd2   :  { %414 = vmatpush.msrb.mxu0 %v1382_v39  ;;  %434 = vmatpush.msrb.mxu1 %v1387_v40 }
  0xd3   :  { %454 = vmatpush.msrb.mxu2 %v1394_v41  ;;  %474 = vmatpush.msrb.mxu3 %v1423_v46 }
  0xd4   :  { %415 = vmatpush.msrb.mxu0 %v1406_v43  ;;  %435 = vmatpush.msrb.mxu1 %v2534_v44 }
  0xd5   :  { %455 = vmatpush.msrb.mxu2 %v2535_v45  ;;  %475 = vmatpush.msrb.mxu3 %v2536_v47 }
  0xd6   :  { %416 = vmatpush.msrb.mxu0 %v2537_v48  ;;  %436 = vmatpush.msrb.mxu1 %v2538_v49 }
  0xd7   :  { %456 = vmatpush.msrb.mxu2 %v2539_v51  ;;  %476 = vmatpush.msrb.mxu3 %v2540_v54 }
  0xd8   :  { %417 = vmatpush.msrb.mxu0 %v2541_v55  ;;  %437 = vmatpush.msrb.mxu1 %v2542_v58  ;;  %v2552_v55 = vld [vmem:[#allocation23_spill] sm:$0xff] }
  0xd9   :  { %457 = vmatpush.msrb.mxu2 %v2543_v53  ;;  %477 = vmatpush.msrb.mxu3 %v2544_v56  ;;  %v943_v56 = vld [vmem:[%s2448_s0 + $0x20] sm:$0xff] }
  0xda   :  { %418 = vmatpush.msrb.mxu0 %v2545_v62  ;;  %438 = vmatpush.msrb.mxu1 %v2546_v52  ;;  %v944_v52 = vld [vmem:[%s2448_s0 + $0x28] sm:$0xff] }
  0xdb   :  { %458 = vmatpush.msrb.mxu2 %v2547_v63  ;;  %478 = vmatpush.msrb.mxu3 %v2548_v59 }
  0xdc   :  { %419 = vmatpush.msrb.mxu0 %v2549_v57  ;;  %439 = vmatpush.msrb.mxu1 %v2550_v61 }
  0xdd   :  { %459 = vmatpush.msrb.mxu2 %v2551_v60  ;;  %479 = vmatpush.msrb.mxu3 %v2552_v55  ;;  %v945_v60 = vld [vmem:[%s2448_s0 + $0x30] sm:$0xff]  ;;  %v946_v55 = vld [vmem:[%s2448_s0 + $0x38] sm:$0xff] }
 0x139   :  { %v211_v62 = vpop.f32.mrf.mxu0  ;;  %v231_v63 = vpop.f32.mrf.mxu1 }
 0x13a   :  { %v212_v53 = vadd.f32 %v943_v56, %v211_v62  ;;  %v232_v59 = vadd.f32 %v944_v52, %v231_v63 }
 0x13c   :  { %v274_v58 = vmul.f32 0.5, %v212_v53  ;;  %v278_v57 = vmul.f32 0.5, %v232_v59 }
 0x13e   :  { %989 = vtanh.f32 %v274_v58 }
 0x13f   :  { %991 = vtanh.f32 %v278_v57 }
 0x140   :  { %v251_v61 = vpop.f32.mrf.mxu2  ;;  %v271_v54 = vpop.f32.mrf.mxu3 }
 0x141   :  { %v252_v51 = vadd.f32 %v945_v60, %v251_v61  ;;  %v272_v49 = vadd.f32 %v946_v55, %v271_v54  ;;  %v2558_v55 = vld [vmem:[#allocation8_spill] sm:$0xff]  ;;  %v2559_v61 = vld [vmem:[#allocation9_spill] sm:$0xff]  ;;  %v2560_v60 = vld [vmem:[#allocation14_spill] sm:$0xff] }
 0x143   :  { %993 = vtanh.f32 %v252_v51  ;;  %v283_v48 = vmul.f32 0.5, %v272_v49 }
 0x144   :  { %v990_v56 = vpop.eup %989 }
 0x145   :  { %v992_v62 = vpop.eup %991  ;;  %v276_v53 = vmul.f32 0.5, %v990_v56  ;;  %995 = vtanh.f32 %v283_v48  ;;  %v2557_v48 = vld [vmem:[#allocation7_spill] sm:$0xff] }
 0x146   :  { %v280_v52 = vmul.f32 0.5, %v992_v62  ;;  %v2561_v56 = vld [vmem:[#allocation11_spill] sm:$0xff]  ;;  %v2562_v62 = vld [vmem:[#allocation12_spill] sm:$0xff] }
 0x147   :  { %v277_v58 = vadd.f32 0.5, %v276_v53  ;;  %v2563_v53 = vld [vmem:[#allocation13_spill] sm:$0xff] }
 0x148   :  { %v281_v63 = vadd.f32 0.5, %v280_v52  ;;  %v2564_v52 = vld [vmem:[#allocation18_spill] sm:$0xff] }
 0x149   :  { %v994_v59 = vpop.eup %993 }
 0x14a   :  { %v287_v47 = vmul.f32 %v281_v63, %v1673_v50  ;;  %v288_v45 = vmul.f32 %v994_v59, %v277_v58  ;;  %v2553_v50 = vld [vmem:[#allocation4_spill] sm:$0xff]  ;;  %v2565_v58 = vld [vmem:[#allocation15_spill] sm:$0xff]  ;;  %v2567_v59 = vld [vmem:[#allocation17_spill] sm:$0xff] }
 0x14b   :  { %v996_v44 = vpop.eup %995  ;;  %v2566_v63 = vld [vmem:[#allocation16_spill] sm:$0xff] }
 0x14c   :  { %v1756_v43 = vadd.f32 %v288_v45, %v287_v47  ;;  %v285_v57 = vmul.f32 0.5, %v996_v44  ;;  %v2554_v44 = vld [vmem:[#allocation5_spill] sm:$0xff]  ;;  %v2555_v45 = vld [vmem:[#allocation6_spill] sm:$0xff] }
 0x14d   :  { %v2556_v47 = vld [vmem:[#allocation10_spill] sm:$0xff] }
 0x14e   :  { %997 = vtanh.f32 %v1756_v43  ;;  %v286_v54 = vadd.f32 0.5, %v285_v57  ;;  %v2568_v57 = vld [vmem:[#allocation22_spill] sm:$0xff] }
 0x154   :  { %v998_v51 = vpop.eup %997 }
 0x155   :  { %v291_v49 = vmul.f32 %v998_v51, %v286_v54  ;;  %v2569_v54 = vld [vmem:[#allocation19_spill] sm:$0xff]  ;;  %v2570_v51 = vld [vmem:[#allocation20_spill] sm:$0xff] }
 0x157   :  { %947 = vst [vmem:[%s2449_s2 + $0x8] sm:$0xff] %v291_v49  ;;  %315 = vmatmul.f32.vlgmr.msra.gmra.mxu0 %v291_v49  ;;  %335 = vmatmul.f32.vlgmr.msra.gmra.mxu1 %v291_v49 }
 0x158   :  { %355 = vmatmul.f32.vlgmr.msra.gmra.mxu2 %v291_v49  ;;  %375 = vmatmul.f32.vlgmr.msra.gmra.mxu3 %v291_v49  ;;  %v2571_v49 = vld [vmem:[#allocation21_spill] sm:$0xff] }
 0x159   :  { %509 = vmatpush.msra.mxu0 %v1152_v0  ;;  %529 = vmatpush.msra.mxu1 %v1157_v1 }
 0x15a   :  { %549 = vmatpush.msra.mxu2 %v1162_v2  ;;  %569 = vmatpush.msra.mxu3 %v1202_v9 }
 0x15b   :  { %510 = vmatpush.msra.mxu0 %v1169_v3  ;;  %530 = vmatpush.msra.mxu1 %v1174_v4 }
 0x15c   :  { %550 = vmatpush.msra.mxu2 %v1179_v5  ;;  %570 = vmatpush.msra.mxu3 %v1219_v12 }
 0x15d   :  { %511 = vmatpush.msra.mxu0 %v1185_v6  ;;  %531 = vmatpush.msra.mxu1 %v1190_v7 }
 0x15e   :  { %551 = vmatpush.msra.mxu2 %v1197_v8  ;;  %571 = vmatpush.msra.mxu3 %v1231_v14 }
 0x15f   :  { %512 = vmatpush.msra.mxu0 %v1209_v10  ;;  %532 = vmatpush.msra.mxu1 %v1214_v11 }
 0x160   :  { %552 = vmatpush.msra.mxu2 %v1226_v13  ;;  %572 = vmatpush.msra.mxu3 %v1255_v18 }
 0x161   :  { %513 = vmatpush.msra.mxu0 %v1238_v15  ;;  %533 = vmatpush.msra.mxu1 %v1243_v16 }
 0x162   :  { %553 = vmatpush.msra.mxu2 %v1250_v17  ;;  %573 = vmatpush.msra.mxu3 %v1279_v22 }
 0x163   :  { %514 = vmatpush.msra.mxu0 %v1262_v19  ;;  %534 = vmatpush.msra.mxu1 %v1267_v20 }
 0x164   :  { %554 = vmatpush.msra.mxu2 %v1274_v21  ;;  %574 = vmatpush.msra.mxu3 %v1303_v26 }
 0x165   :  { %515 = vmatpush.msra.mxu0 %v1286_v23  ;;  %535 = vmatpush.msra.mxu1 %v1291_v24 }
 0x166   :  { %555 = vmatpush.msra.mxu2 %v1298_v25  ;;  %575 = vmatpush.msra.mxu3 %v1327_v30 }
 0x167   :  { %516 = vmatpush.msra.mxu0 %v1310_v27  ;;  %536 = vmatpush.msra.mxu1 %v1315_v28 }
 0x168   :  { %556 = vmatpush.msra.mxu2 %v1322_v29  ;;  %576 = vmatpush.msra.mxu3 %v1351_v34 }
 0x169   :  { %517 = vmatpush.msra.mxu0 %v1334_v31  ;;  %537 = vmatpush.msra.mxu1 %v1339_v32 }
 0x16a   :  { %557 = vmatpush.msra.mxu2 %v1346_v33  ;;  %577 = vmatpush.msra.mxu3 %v1375_v38 }
 0x16b   :  { %518 = vmatpush.msra.mxu0 %v1358_v35  ;;  %538 = vmatpush.msra.mxu1 %v1363_v36 }
 0x16c   :  { %558 = vmatpush.msra.mxu2 %v1370_v37  ;;  %578 = vmatpush.msra.mxu3 %v1399_v42 }
 0x16d   :  { %519 = vmatpush.msra.mxu0 %v1382_v39  ;;  %539 = vmatpush.msra.mxu1 %v1387_v40 }
 0x16e   :  { %559 = vmatpush.msra.mxu2 %v1394_v41  ;;  %579 = vmatpush.msra.mxu3 %v1423_v46 }
 0x16f   :  { %520 = vmatpush.msra.mxu0 %v2553_v50  ;;  %540 = vmatpush.msra.mxu1 %v2554_v44 }
 0x170   :  { %560 = vmatpush.msra.mxu2 %v2555_v45  ;;  %580 = vmatpush.msra.mxu3 %v2556_v47 }
 0x171   :  { %521 = vmatpush.msra.mxu0 %v2557_v48  ;;  %541 = vmatpush.msra.mxu1 %v2558_v55 }
 0x172   :  { %561 = vmatpush.msra.mxu2 %v2559_v61  ;;  %581 = vmatpush.msra.mxu3 %v2560_v60 }
 0x173   :  { %522 = vmatpush.msra.mxu0 %v2561_v56  ;;  %542 = vmatpush.msra.mxu1 %v2562_v62  ;;  %v2572_v56 = vld [vmem:[#allocation23_spill] sm:$0xff] }
 0x174   :  { %562 = vmatpush.msra.mxu2 %v2563_v53  ;;  %582 = vmatpush.msra.mxu3 %v2564_v52  ;;  %v948_v52 = vld [vmem:[%s2448_s0 + $0x40] sm:$0xff] }
 0x175   :  { %523 = vmatpush.msra.mxu0 %v2565_v58  ;;  %543 = vmatpush.msra.mxu1 %v2566_v63  ;;  %v949_v63 = vld [vmem:[%s2448_s0 + $0x48] sm:$0xff] }
 0x176   :  { %563 = vmatpush.msra.mxu2 %v2567_v59  ;;  %583 = vmatpush.msra.mxu3 %v2568_v57 }
 0x177   :  { %524 = vmatpush.msra.mxu0 %v2569_v54  ;;  %544 = vmatpush.msra.mxu1 %v2570_v51 }
 0x178   :  { %564 = vmatpush.msra.mxu2 %v2571_v49  ;;  %584 = vmatpush.msra.mxu3 %v2572_v56  ;;  %v950_v49 = vld [vmem:[%s2448_s0 + $0x50] sm:$0xff]  ;;  %v951_v56 = vld [vmem:[%s2448_s0 + $0x58] sm:$0xff] }
 0x1d4   :  { %v316_v58 = vpop.f32.mrf.mxu0  ;;  %v336_v59 = vpop.f32.mrf.mxu1 }
 0x1d5   :  { %v317_v53 = vadd.f32 %v948_v52, %v316_v58  ;;  %v337_v57 = vadd.f32 %v949_v63, %v336_v59 }
 0x1d7   :  { %v379_v62 = vmul.f32 0.5, %v317_v53  ;;  %v383_v54 = vmul.f32 0.5, %v337_v57 }
 0x1d9   :  { %999 = vtanh.f32 %v379_v62 }
 0x1da   :  { %1001 = vtanh.f32 %v383_v54 }
 0x1db   :  { %v356_v51 = vpop.f32.mrf.mxu2  ;;  %v376_v60 = vpop.f32.mrf.mxu3 }
 0x1dc   :  { %v357_v61 = vadd.f32 %v950_v49, %v356_v51  ;;  %v377_v55 = vadd.f32 %v951_v56, %v376_v60  ;;  %v1937_v51 = vld [vmem:[%s2447_s1 + $0x1e8] sm:$0xff]  ;;  %v1943_v49 = vld [vmem:[%s2447_s1 + $0x1f0] sm:$0xff] }
 0x1de   :  { %1003 = vtanh.f32 %v357_v61  ;;  %v388_v48 = vmul.f32 0.5, %v377_v55 }
 0x1df   :  { %v1000_v52 = vpop.eup %999 }
 0x1e0   :  { %v1002_v58 = vpop.eup %1001  ;;  %v381_v53 = vmul.f32 0.5, %v1000_v52  ;;  %1005 = vtanh.f32 %v388_v48  ;;  %v1949_v52 = vld [vmem:[%s2447_s1 + $0x1f8] sm:$0xff] }
 0x1e1   :  { %v385_v63 = vmul.f32 0.5, %v1002_v58  ;;  %v1955_v58 = vld [vmem:[%s2447_s1 + $0x1c0] sm:$0xff] }
 0x1e2   :  { %v382_v62 = vadd.f32 0.5, %v381_v53  ;;  %v1961_v53 = vld [vmem:[%s2447_s1 + $0x1c8] sm:$0xff] }
 0x1e3   :  { %v386_v59 = vadd.f32 0.5, %v385_v63  ;;  %v1967_v63 = vld [vmem:[%s2447_s1 + $0x1d0] sm:$0xff] }
 0x1e4   :  { %v1004_v57 = vpop.eup %1003 }
 0x1e5   :  { %v392_v47 = vmul.f32 %v386_v59, %v1756_v43  ;;  %v393_v45 = vmul.f32 %v1004_v57, %v382_v62  ;;  %v1973_v62 = vld [vmem:[%s2447_s1 + $0x1d8] sm:$0xff]  ;;  %v1979_v59 = vld [vmem:[%s2447_s1 + $0x1a0] sm:$0xff]  ;;  %v1985_v57 = vld [vmem:[%s2447_s1 + $0x1a8] sm:$0xff] }
 0x1e6   :  { %v1006_v44 = vpop.eup %1005 }
 0x1e7   :  { %v1839_v50 = vadd.f32 %v393_v45, %v392_v47  ;;  %v390_v54 = vmul.f32 0.5, %v1006_v44 }
 0x1e9   :  { %1007 = vtanh.f32 %v1839_v50  ;;  %v391_v60 = vadd.f32 0.5, %v390_v54  ;;  %v1991_v54 = vld [vmem:[%s2447_s1 + $0x1b0] sm:$0xff] }
 0x1ef   :  { %v1008_v61 = vpop.eup %1007 }
 0x1f0   :  { %v396_v55 = vmul.f32 %v1008_v61, %v391_v60  ;;  %v1997_v60 = vld [vmem:[%s2447_s1 + $0x1b8] sm:$0xff]  ;;  %v2003_v61 = vld [vmem:[%s2447_s1 + $0x180] sm:$0xff] }
 0x1f2   :  { %952 = vst [vmem:[%s2449_s2 + $0x10] sm:$0xff] %v396_v55  ;;  %420 = vmatmul.f32.vlgmr.msrb.gmra.mxu0 %v396_v55  ;;  %440 = vmatmul.f32.vlgmr.msrb.gmra.mxu1 %v396_v55 }
 0x1f3   :  { %460 = vmatmul.f32.vlgmr.msrb.gmra.mxu2 %v396_v55  ;;  %480 = vmatmul.f32.vlgmr.msrb.gmra.mxu3 %v396_v55  ;;  %v2009_v55 = vld [vmem:[%s2447_s1 + $0x188] sm:$0xff] }
 0x1f4   :  { %614 = vmatpush.msrb.mxu0 %v1152_v0  ;;  %634 = vmatpush.msrb.mxu1 %v1157_v1  ;;  %v2573_v0 = vld [vmem:[#allocation4_spill] sm:$0xff]  ;;  %v2574_v1 = vld [vmem:[#allocation5_spill] sm:$0xff] }
 0x1f5   :  { %654 = vmatpush.msrb.mxu2 %v1162_v2  ;;  %674 = vmatpush.msrb.mxu3 %v1202_v9  ;;  %v2575_v2 = vld [vmem:[#allocation6_spill] sm:$0xff]  ;;  %v2582_v9 = vld [vmem:[#allocation12_spill] sm:$0xff] }
 0x1f6   :  { %615 = vmatpush.msrb.mxu0 %v1169_v3  ;;  %635 = vmatpush.msrb.mxu1 %v1174_v4  ;;  %v2576_v3 = vld [vmem:[#allocation10_spill] sm:$0xff]  ;;  %v2577_v4 = vld [vmem:[#allocation7_spill] sm:$0xff] }
 0x1f7   :  { %655 = vmatpush.msrb.mxu2 %v1179_v5  ;;  %675 = vmatpush.msrb.mxu3 %v1219_v12  ;;  %v2578_v5 = vld [vmem:[#allocation8_spill] sm:$0xff]  ;;  %v2585_v12 = vld [vmem:[#allocation15_spill] sm:$0xff] }
 0x1f8   :  { %616 = vmatpush.msrb.mxu0 %v1185_v6  ;;  %636 = vmatpush.msrb.mxu1 %v1190_v7  ;;  %v2579_v6 = vld [vmem:[#allocation9_spill] sm:$0xff]  ;;  %v2580_v7 = vld [vmem:[#allocation14_spill] sm:$0xff] }
 0x1f9   :  { %656 = vmatpush.msrb.mxu2 %v1197_v8  ;;  %676 = vmatpush.msrb.mxu3 %v1231_v14  ;;  %v2581_v8 = vld [vmem:[#allocation11_spill] sm:$0xff]  ;;  %v2587_v14 = vld [vmem:[#allocation17_spill] sm:$0xff] }
 0x1fa   :  { %617 = vmatpush.msrb.mxu0 %v1209_v10  ;;  %637 = vmatpush.msrb.mxu1 %v1214_v11  ;;  %v2583_v10 = vld [vmem:[#allocation13_spill] sm:$0xff]  ;;  %v2584_v11 = vld [vmem:[#allocation18_spill] sm:$0xff] }
 0x1fb   :  { %657 = vmatpush.msrb.mxu2 %v1226_v13  ;;  %677 = vmatpush.msrb.mxu3 %v1255_v18  ;;  %v2586_v13 = vld [vmem:[#allocation16_spill] sm:$0xff]  ;;  %v2591_v18 = vld [vmem:[#allocation21_spill] sm:$0xff] }
 0x1fc   :  { %618 = vmatpush.msrb.mxu0 %v1238_v15  ;;  %638 = vmatpush.msrb.mxu1 %v1243_v16  ;;  %v2588_v15 = vld [vmem:[#allocation22_spill] sm:$0xff]  ;;  %v2589_v16 = vld [vmem:[#allocation19_spill] sm:$0xff] }
 0x1fd   :  { %658 = vmatpush.msrb.mxu2 %v1250_v17  ;;  %678 = vmatpush.msrb.mxu3 %v1279_v22  ;;  %v2590_v17 = vld [vmem:[#allocation20_spill] sm:$0xff] }
 0x1fe   :  { %619 = vmatpush.msrb.mxu0 %v1262_v19  ;;  %639 = vmatpush.msrb.mxu1 %v1267_v20  ;;  %v2592_v19 = vld [vmem:[#allocation23_spill] sm:$0xff]  ;;  %v953_v20 = vld [vmem:[%s2448_s0 + $0x60] sm:$0xff] }
 0x1ff   :  { %659 = vmatpush.msrb.mxu2 %v1274_v21  ;;  %679 = vmatpush.msrb.mxu3 %v1303_v26  ;;  %v954_v21 = vld [vmem:[%s2448_s0 + $0x68] sm:$0xff] }
 0x200   :  { %620 = vmatpush.msrb.mxu0 %v1286_v23  ;;  %640 = vmatpush.msrb.mxu1 %v1291_v24 }
 0x201   :  { %660 = vmatpush.msrb.mxu2 %v1298_v25  ;;  %680 = vmatpush.msrb.mxu3 %v1327_v30 }
 0x202   :  { %621 = vmatpush.msrb.mxu0 %v1310_v27  ;;  %641 = vmatpush.msrb.mxu1 %v1315_v28  ;;  %v955_v28 = vld [vmem:[%s2448_s0 + $0x70] sm:$0xff] }
 0x203   :  { %661 = vmatpush.msrb.mxu2 %v1322_v29  ;;  %681 = vmatpush.msrb.mxu3 %v1351_v34  ;;  %v956_v29 = vld [vmem:[%s2448_s0 + $0x78] sm:$0xff] }
 0x204   :  { %622 = vmatpush.msrb.mxu0 %v1334_v31  ;;  %642 = vmatpush.msrb.mxu1 %v1339_v32 }
 0x205   :  { %662 = vmatpush.msrb.mxu2 %v1346_v33  ;;  %682 = vmatpush.msrb.mxu3 %v1375_v38 }
 0x206   :  { %623 = vmatpush.msrb.mxu0 %v1358_v35  ;;  %643 = vmatpush.msrb.mxu1 %v1363_v36 }
 0x207   :  { %663 = vmatpush.msrb.mxu2 %v1370_v37  ;;  %683 = vmatpush.msrb.mxu3 %v1399_v42 }
 0x208   :  { %624 = vmatpush.msrb.mxu0 %v1382_v39  ;;  %644 = vmatpush.msrb.mxu1 %v1387_v40 }
 0x209   :  { %664 = vmatpush.msrb.mxu2 %v1394_v41  ;;  %684 = vmatpush.msrb.mxu3 %v1423_v46 }
 0x20a   :  { %625 = vmatpush.msrb.mxu0 %v2573_v0  ;;  %645 = vmatpush.msrb.mxu1 %v2574_v1  ;;  %v2015_v0 = vld [vmem:[%s2447_s1 + $0x190] sm:$0xff]  ;;  %v2021_v1 = vld [vmem:[%s2447_s1 + $0x198] sm:$0xff] }
 0x20b   :  { %665 = vmatpush.msrb.mxu2 %v2575_v2  ;;  %685 = vmatpush.msrb.mxu3 %v2576_v3  ;;  %v2027_v2 = vld [vmem:[%s2447_s1 + $0x160] sm:$0xff]  ;;  %v2033_v3 = vld [vmem:[%s2447_s1 + $0x168] sm:$0xff] }
 0x20c   :  { %626 = vmatpush.msrb.mxu0 %v2577_v4  ;;  %646 = vmatpush.msrb.mxu1 %v2578_v5  ;;  %v2039_v4 = vld [vmem:[%s2447_s1 + $0x170] sm:$0xff]  ;;  %v2045_v5 = vld [vmem:[%s2447_s1 + $0x178] sm:$0xff] }
 0x20d   :  { %666 = vmatpush.msrb.mxu2 %v2579_v6  ;;  %686 = vmatpush.msrb.mxu3 %v2580_v7  ;;  %v2051_v6 = vld [vmem:[%s2447_s1 + $0x140] sm:$0xff]  ;;  %v2057_v7 = vld [vmem:[%s2447_s1 + $0x148] sm:$0xff] }
 0x20e   :  { %627 = vmatpush.msrb.mxu0 %v2581_v8  ;;  %647 = vmatpush.msrb.mxu1 %v2582_v9  ;;  %v2063_v8 = vld [vmem:[%s2447_s1 + $0x150] sm:$0xff]  ;;  %v2069_v9 = vld [vmem:[%s2447_s1 + $0x158] sm:$0xff] }
 0x20f   :  { %667 = vmatpush.msrb.mxu2 %v2583_v10  ;;  %687 = vmatpush.msrb.mxu3 %v2584_v11  ;;  %v2075_v10 = vld [vmem:[%s2447_s1 + $0x120] sm:$0xff]  ;;  %v2081_v11 = vld [vmem:[%s2447_s1 + $0x128] sm:$0xff] }
 0x210   :  { %628 = vmatpush.msrb.mxu0 %v2585_v12  ;;  %648 = vmatpush.msrb.mxu1 %v2586_v13  ;;  %v2087_v12 = vld [vmem:[%s2447_s1 + $0x130] sm:$0xff]  ;;  %v2093_v13 = vld [vmem:[%s2447_s1 + $0x138] sm:$0xff] }
 0x211   :  { %668 = vmatpush.msrb.mxu2 %v2587_v14  ;;  %688 = vmatpush.msrb.mxu3 %v2588_v15  ;;  %v2099_v14 = vld [vmem:[%s2447_s1 + $0x100] sm:$0xff]  ;;  %v2105_v15 = vld [vmem:[%s2447_s1 + $0x108] sm:$0xff] }
 0x212   :  { %629 = vmatpush.msrb.mxu0 %v2589_v16  ;;  %649 = vmatpush.msrb.mxu1 %v2590_v17  ;;  %v2111_v16 = vld [vmem:[%s2447_s1 + $0x110] sm:$0xff]  ;;  %v2117_v17 = vld [vmem:[%s2447_s1 + $0x118] sm:$0xff] }
 0x213   :  { %669 = vmatpush.msrb.mxu2 %v2591_v18  ;;  %689 = vmatpush.msrb.mxu3 %v2592_v19  ;;  %v2123_v18 = vld [vmem:[%s2447_s1 + $0xe0] sm:$0xff]  ;;  %v2129_v19 = vld [vmem:[%s2447_s1 + $0xe8] sm:$0xff] }
 0x26f   :  { %v421_v22 = vpop.f32.mrf.mxu0  ;;  %v441_v23 = vpop.f32.mrf.mxu1 }
 0x270   :  { %v422_v24 = vadd.f32 %v953_v20, %v421_v22  ;;  %v442_v25 = vadd.f32 %v954_v21, %v441_v23  ;;  %v2135_v20 = vld [vmem:[%s2447_s1 + $0xf0] sm:$0xff]  ;;  %v2141_v21 = vld [vmem:[%s2447_s1 + $0xf8] sm:$0xff]  ;;  %v2147_v22 = vld [vmem:[%s2447_s1 + $0xc0] sm:$0xff] }
 0x271   :  { %v2153_v23 = vld [vmem:[%s2447_s1 + $0xc8] sm:$0xff] }
 0x272   :  { %v484_v26 = vmul.f32 0.5, %v422_v24  ;;  %v488_v27 = vmul.f32 0.5, %v442_v25  ;;  %v2159_v24 = vld [vmem:[%s2447_s1 + $0xd0] sm:$0xff]  ;;  %v2165_v25 = vld [vmem:[%s2447_s1 + $0xd8] sm:$0xff] }
 0x274   :  { %1009 = vtanh.f32 %v484_v26  ;;  %v2171_v26 = vld [vmem:[%s2447_s1 + $0xa0] sm:$0xff] }
 0x275   :  { %1011 = vtanh.f32 %v488_v27  ;;  %v2177_v27 = vld [vmem:[%s2447_s1 + $0xa8] sm:$0xff] }
 0x276   :  { %v461_v30 = vpop.f32.mrf.mxu2  ;;  %v481_v31 = vpop.f32.mrf.mxu3 }
 0x277   :  { %v462_v32 = vadd.f32 %v955_v28, %v461_v30  ;;  %v482_v33 = vadd.f32 %v956_v29, %v481_v31  ;;  %v2183_v28 = vld [vmem:[%s2447_s1 + $0xb0] sm:$0xff]  ;;  %v2189_v29 = vld [vmem:[%s2447_s1 + $0xb8] sm:$0xff]  ;;  %v2195_v30 = vld [vmem:[%s2447_s1 + $0x80] sm:$0xff] }
 0x278   :  { %2593 = vst [vmem:[#allocation4_spill] sm:$0xff] %v2195_v30  ;;  %v2201_v31 = vld [vmem:[%s2447_s1 + $0x88] sm:$0xff] }
 0x279   :  { %1013 = vtanh.f32 %v462_v32  ;;  %v493_v34 = vmul.f32 0.5, %v482_v33  ;;  %2594 = vst [vmem:[#allocation5_spill] sm:$0xff] %v2201_v31  ;;  %v2207_v32 = vld [vmem:[%s2447_s1 + $0x90] sm:$0xff]  ;;  %v2213_v33 = vld [vmem:[%s2447_s1 + $0x98] sm:$0xff] }
 0x27a   :  { %v1010_v35 = vpop.eup %1009  ;;  %2595 = vst [vmem:[#allocation6_spill] sm:$0xff] %v2207_v32 }
 0x27b   :  { %v1012_v36 = vpop.eup %1011  ;;  %v486_v37 = vmul.f32 0.5, %v1010_v35  ;;  %1015 = vtanh.f32 %v493_v34  ;;  %2596 = vst [vmem:[#allocation10_spill] sm:$0xff] %v2213_v33  ;;  %v2219_v34 = vld [vmem:[%s2447_s1 + $0x60] sm:$0xff]  ;;  %v2225_v35 = vld [vmem:[%s2447_s1 + $0x68] sm:$0xff] }
 0x27c   :  { %v490_v38 = vmul.f32 0.5, %v1012_v36  ;;  %2597 = vst [vmem:[#allocation7_spill] sm:$0xff] %v2219_v34  ;;  %v2231_v36 = vld [vmem:[%s2447_s1 + $0x70] sm:$0xff] }
 0x27d   :  { %v487_v39 = vadd.f32 0.5, %v486_v37  ;;  %2598 = vst [vmem:[#allocation8_spill] sm:$0xff] %v2225_v35  ;;  %v2237_v37 = vld [vmem:[%s2447_s1 + $0x78] sm:$0xff] }
 0x27e   :  { %v491_v40 = vadd.f32 0.5, %v490_v38  ;;  %2599 = vst [vmem:[#allocation9_spill] sm:$0xff] %v2231_v36  ;;  %v2243_v38 = vld [vmem:[%s2447_s1 + $0x40] sm:$0xff] }
 0x27f   :  { %v1014_v41 = vpop.eup %1013  ;;  %2600 = vst [vmem:[#allocation14_spill] sm:$0xff] %v2237_v37 }
 0x280   :  { %v497_v42 = vmul.f32 %v491_v40, %v1839_v50  ;;  %v498_v43 = vmul.f32 %v1014_v41, %v487_v39  ;;  %v1931_v50 = vld [vmem:[%s2447_s1 + $0x1e0] sm:$0xff]  ;;  %2601 = vst [vmem:[#allocation11_spill] sm:$0xff] %v2243_v38  ;;  %v2249_v39 = vld [vmem:[%s2447_s1 + $0x48] sm:$0xff]  ;;  %v2255_v40 = vld [vmem:[%s2447_s1 + $0x50] sm:$0xff] }
 0x281   :  { %v1016_v46 = vpop.eup %1015  ;;  %2602 = vst [vmem:[#allocation12_spill] sm:$0xff] %v2249_v39  ;;  %v2261_v41 = vld [vmem:[%s2447_s1 + $0x58] sm:$0xff] }
 0x282   :  { %v1922_v44 = vadd.f32 %v498_v43, %v497_v42  ;;  %v495_v45 = vmul.f32 0.5, %v1016_v46  ;;  %2603 = vst [vmem:[#allocation13_spill] sm:$0xff] %v2255_v40  ;;  %v2267_v42 = vld [vmem:[%s2447_s1 + $0x20] sm:$0xff]  ;;  %v2273_v43 = vld [vmem:[%s2447_s1 + $0x28] sm:$0xff]  ;;  %v2279_v46 = vld [vmem:[%s2447_s1 + $0x30] sm:$0xff] }
 0x283   :  { %2604 = vst [vmem:[#allocation18_spill] sm:$0xff] %v2261_v41 }
 0x284   :  { %1017 = vtanh.f32 %v1922_v44  ;;  %v496_v47 = vadd.f32 0.5, %v495_v45  ;;  %2605 = vst [vmem:[#allocation15_spill] sm:$0xff] %v2267_v42  ;;  %v2285_v45 = vld [vmem:[%s2447_s1 + $0x38] sm:$0xff] }
 0x285   :  { %2606 = vst [vmem:[#allocation16_spill] sm:$0xff] %v2273_v43 }
 0x286   :  { %2607 = vst [vmem:[#allocation17_spill] sm:$0xff] %v2279_v46 }
 0x287   :  { %2608 = vst [vmem:[#allocation22_spill] sm:$0xff] %v2285_v45 }
 0x28a   :  { %v1018_v48 = vpop.eup %1017 }
 0x28b   :  { %v501_v56 = vmul.f32 %v1018_v48, %v496_v47  ;;  %v2291_v47 = vld [vmem:[%s2447_s1] sm:$0xff]  ;;  %v2297_v48 = vld [vmem:[%s2447_s1 + $0x8] sm:$0xff] }
 0x28c   :  { %2609 = vst [vmem:[#allocation19_spill] sm:$0xff] %v2291_v47 }
 0x28d   :  { %957 = vst [vmem:[%s2449_s2 + $0x18] sm:$0xff] %v501_v56  ;;  %525 = vmatmul.f32.vlgmr.msra.gmra.mxu0 %v501_v56  ;;  %545 = vmatmul.f32.vlgmr.msra.gmra.mxu1 %v501_v56 }
 0x28e   :  { %565 = vmatmul.f32.vlgmr.msra.gmra.mxu2 %v501_v56  ;;  %585 = vmatmul.f32.vlgmr.msra.gmra.mxu3 %v501_v56  ;;  %2610 = vst [vmem:[#allocation20_spill] sm:$0xff] %v2297_v48  ;;  %v2303_v56 = vld [vmem:[%s2447_s1 + $0x10] sm:$0xff] }
 0x28f   :  { %719 = vmatpush.msra.mxu0 %v1931_v50  ;;  %739 = vmatpush.msra.mxu1 %v1937_v51  ;;  %2611 = vst [vmem:[#allocation21_spill] sm:$0xff] %v2303_v56 }
 0x290   :  { %759 = vmatpush.msra.mxu2 %v1943_v49  ;;  %779 = vmatpush.msra.mxu3 %v1949_v52 }
 0x291   :  { %720 = vmatpush.msra.mxu0 %v1955_v58  ;;  %740 = vmatpush.msra.mxu1 %v1961_v53 }
 0x292   :  { %760 = vmatpush.msra.mxu2 %v1967_v63  ;;  %780 = vmatpush.msra.mxu3 %v1973_v62 }
 0x293   :  { %721 = vmatpush.msra.mxu0 %v1979_v59  ;;  %741 = vmatpush.msra.mxu1 %v1985_v57 }
 0x294   :  { %761 = vmatpush.msra.mxu2 %v1991_v54  ;;  %781 = vmatpush.msra.mxu3 %v1997_v60 }
 0x295   :  { %722 = vmatpush.msra.mxu0 %v2003_v61  ;;  %742 = vmatpush.msra.mxu1 %v2009_v55 }
 0x296   :  { %762 = vmatpush.msra.mxu2 %v2015_v0  ;;  %782 = vmatpush.msra.mxu3 %v2021_v1 }
 0x297   :  { %723 = vmatpush.msra.mxu0 %v2027_v2  ;;  %743 = vmatpush.msra.mxu1 %v2033_v3 }
 0x298   :  { %763 = vmatpush.msra.mxu2 %v2039_v4  ;;  %783 = vmatpush.msra.mxu3 %v2045_v5 }
 0x299   :  { %724 = vmatpush.msra.mxu0 %v2051_v6  ;;  %744 = vmatpush.msra.mxu1 %v2057_v7 }
 0x29a   :  { %764 = vmatpush.msra.mxu2 %v2063_v8  ;;  %784 = vmatpush.msra.mxu3 %v2069_v9 }
 0x29b   :  { %725 = vmatpush.msra.mxu0 %v2075_v10  ;;  %745 = vmatpush.msra.mxu1 %v2081_v11 }
 0x29c   :  { %765 = vmatpush.msra.mxu2 %v2087_v12  ;;  %785 = vmatpush.msra.mxu3 %v2093_v13 }
 0x29d   :  { %726 = vmatpush.msra.mxu0 %v2099_v14  ;;  %746 = vmatpush.msra.mxu1 %v2105_v15 }
 0x29e   :  { %766 = vmatpush.msra.mxu2 %v2111_v16  ;;  %786 = vmatpush.msra.mxu3 %v2117_v17 }
 0x29f   :  { %727 = vmatpush.msra.mxu0 %v2123_v18  ;;  %747 = vmatpush.msra.mxu1 %v2129_v19 }
 0x2a0   :  { %767 = vmatpush.msra.mxu2 %v2135_v20  ;;  %787 = vmatpush.msra.mxu3 %v2141_v21 }
 0x2a1   :  { %728 = vmatpush.msra.mxu0 %v2147_v22  ;;  %748 = vmatpush.msra.mxu1 %v2153_v23 }
 0x2a2   :  { %768 = vmatpush.msra.mxu2 %v2159_v24  ;;  %788 = vmatpush.msra.mxu3 %v2165_v25 }
 0x2a3   :  { %729 = vmatpush.msra.mxu0 %v2171_v26  ;;  %749 = vmatpush.msra.mxu1 %v2177_v27 }
 0x2a4   :  { %769 = vmatpush.msra.mxu2 %v2183_v28  ;;  %789 = vmatpush.msra.mxu3 %v2189_v29 }
 0x2a5   :  { %730 = vmatpush.msra.mxu0 %v2195_v30  ;;  %750 = vmatpush.msra.mxu1 %v2201_v31 }
 0x2a6   :  { %770 = vmatpush.msra.mxu2 %v2207_v32  ;;  %790 = vmatpush.msra.mxu3 %v2213_v33 }
 0x2a7   :  { %731 = vmatpush.msra.mxu0 %v2219_v34  ;;  %751 = vmatpush.msra.mxu1 %v2225_v35 }
 0x2a8   :  { %771 = vmatpush.msra.mxu2 %v2231_v36  ;;  %791 = vmatpush.msra.mxu3 %v2237_v37 }
 0x2a9   :  { %732 = vmatpush.msra.mxu0 %v2243_v38  ;;  %752 = vmatpush.msra.mxu1 %v2249_v39  ;;  %v960_v39 = vld [vmem:[%s2448_s0 + $0x90] sm:$0xff] }
 0x2aa   :  { %772 = vmatpush.msra.mxu2 %v2255_v40  ;;  %792 = vmatpush.msra.mxu3 %v2261_v41 }
 0x2ab   :  { %733 = vmatpush.msra.mxu0 %v2267_v42  ;;  %753 = vmatpush.msra.mxu1 %v2273_v43 }
 0x2ac   :  { %773 = vmatpush.msra.mxu2 %v2279_v46  ;;  %793 = vmatpush.msra.mxu3 %v2285_v45  ;;  %v2309_v45 = vld [vmem:[%s2447_s1 + $0x18] sm:$0xff] }
 0x2ad   :  { %734 = vmatpush.msra.mxu0 %v2291_v47  ;;  %754 = vmatpush.msra.mxu1 %v2297_v48  ;;  %2612 = vst [vmem:[#allocation23_spill] sm:$0xff] %v2309_v45  ;;  %v958_v47 = vld [vmem:[%s2448_s0 + $0x80] sm:$0xff]  ;;  %v959_v48 = vld [vmem:[%s2448_s0 + $0x88] sm:$0xff] }
 0x2ae   :  { %774 = vmatpush.msra.mxu2 %v2303_v56  ;;  %794 = vmatpush.msra.mxu3 %v2309_v45  ;;  %v961_v45 = vld [vmem:[%s2448_s0 + $0x98] sm:$0xff] }
 0x30a   :  { %v526_v46 = vpop.f32.mrf.mxu0  ;;  %v546_v43 = vpop.f32.mrf.mxu1 }
 0x30b   :  { %v527_v42 = vadd.f32 %v958_v47, %v526_v46  ;;  %v547_v41 = vadd.f32 %v959_v48, %v546_v43 }
 0x30d   :  { %v589_v56 = vmul.f32 0.5, %v527_v42  ;;  %v593_v40 = vmul.f32 0.5, %v547_v41 }
 0x30f   :  { %1019 = vtanh.f32 %v589_v56 }
 0x310   :  { %1021 = vtanh.f32 %v593_v40  ;;  %v969_v40 = vld [vmem:[%s2448_s0 + $0xc8] sm:$0xff] }
 0x311   :  { %v566_v38 = vpop.f32.mrf.mxu2  ;;  %v586_v37 = vpop.f32.mrf.mxu3 }
 0x312   :  { %v567_v36 = vadd.f32 %v960_v39, %v566_v38  ;;  %v587_v35 = vadd.f32 %v961_v45, %v586_v37 }
 0x314   :  { %1023 = vtanh.f32 %v567_v36  ;;  %v598_v34 = vmul.f32 0.5, %v587_v35 }
 0x315   :  { %v1020_v46 = vpop.eup %1019 }
 0x316   :  { %v1022_v43 = vpop.eup %1021  ;;  %v591_v42 = vmul.f32 0.5, %v1020_v46  ;;  %1025 = vtanh.f32 %v598_v34 }
 0x317   :  { %v595_v41 = vmul.f32 0.5, %v1022_v43 }
 0x318   :  { %v592_v47 = vadd.f32 0.5, %v591_v42 }
 0x319   :  { %v596_v48 = vadd.f32 0.5, %v595_v41 }
 0x31a   :  { %v1024_v56 = vpop.eup %1023 }
 0x31b   :  { %v602_v33 = vmul.f32 %v596_v48, %v1922_v44  ;;  %v603_v32 = vmul.f32 %v1024_v56, %v592_v47  ;;  %v2613_v44 = vld [vmem:[#allocation4_spill] sm:$0xff]  ;;  %v970_v48 = vld [vmem:[%s2448_s0 + $0xd0] sm:$0xff]  ;;  %v971_v56 = vld [vmem:[%s2448_s0 + $0xd8] sm:$0xff] }
 0x31c   :  { %v1026_v31 = vpop.eup %1025 }
 0x31d   :  { %v2325_v30 = vadd.f32 %v603_v32, %v602_v33  ;;  %v600_v38 = vmul.f32 0.5, %v1026_v31 }
 0x31f   :  { %1027 = vtanh.f32 %v2325_v30  ;;  %v601_v37 = vadd.f32 0.5, %v600_v38 }
 0x325   :  { %v1028_v36 = vpop.eup %1027 }
 0x326   :  { %v606_v35 = vmul.f32 %v1028_v36, %v601_v37 }
 0x328   :  { %962 = vst [vmem:[%s2449_s2 + $0x20] sm:$0xff] %v606_v35  ;;  %630 = vmatmul.f32.vlgmr.msrb.gmra.mxu0 %v606_v35  ;;  %650 = vmatmul.f32.vlgmr.msrb.gmra.mxu1 %v606_v35 }
 0x329   :  { %670 = vmatmul.f32.vlgmr.msrb.gmra.mxu2 %v606_v35  ;;  %690 = vmatmul.f32.vlgmr.msrb.gmra.mxu3 %v606_v35 }
 0x32a   :  { %824 = vmatpush.msrb.mxu0 %v1931_v50  ;;  %844 = vmatpush.msrb.mxu1 %v1937_v51  ;;  %v2614_v50 = vld [vmem:[#allocation5_spill] sm:$0xff]  ;;  %v2615_v51 = vld [vmem:[#allocation6_spill] sm:$0xff] }
 0x32b   :  { %864 = vmatpush.msrb.mxu2 %v1943_v49  ;;  %884 = vmatpush.msrb.mxu3 %v1949_v52  ;;  %v2616_v49 = vld [vmem:[#allocation10_spill] sm:$0xff]  ;;  %v2617_v52 = vld [vmem:[#allocation7_spill] sm:$0xff] }
 0x32c   :  { %825 = vmatpush.msrb.mxu0 %v1955_v58  ;;  %845 = vmatpush.msrb.mxu1 %v1961_v53  ;;  %v2618_v58 = vld [vmem:[#allocation8_spill] sm:$0xff]  ;;  %v2619_v53 = vld [vmem:[#allocation9_spill] sm:$0xff] }
 0x32d   :  { %865 = vmatpush.msrb.mxu2 %v1967_v63  ;;  %885 = vmatpush.msrb.mxu3 %v1973_v62  ;;  %v2620_v63 = vld [vmem:[#allocation14_spill] sm:$0xff]  ;;  %v2621_v62 = vld [vmem:[#allocation11_spill] sm:$0xff] }
 0x32e   :  { %826 = vmatpush.msrb.mxu0 %v1979_v59  ;;  %846 = vmatpush.msrb.mxu1 %v1985_v57  ;;  %v2622_v59 = vld [vmem:[#allocation12_spill] sm:$0xff]  ;;  %v2623_v57 = vld [vmem:[#allocation13_spill] sm:$0xff] }
 0x32f   :  { %866 = vmatpush.msrb.mxu2 %v1991_v54  ;;  %886 = vmatpush.msrb.mxu3 %v1997_v60  ;;  %v2624_v54 = vld [vmem:[#allocation18_spill] sm:$0xff]  ;;  %v2625_v60 = vld [vmem:[#allocation15_spill] sm:$0xff] }
 0x330   :  { %827 = vmatpush.msrb.mxu0 %v2003_v61  ;;  %847 = vmatpush.msrb.mxu1 %v2009_v55  ;;  %v2626_v61 = vld [vmem:[#allocation16_spill] sm:$0xff]  ;;  %v2627_v55 = vld [vmem:[#allocation17_spill] sm:$0xff] }
 0x331   :  { %867 = vmatpush.msrb.mxu2 %v2015_v0  ;;  %887 = vmatpush.msrb.mxu3 %v2021_v1  ;;  %v2628_v0 = vld [vmem:[#allocation22_spill] sm:$0xff]  ;;  %v2629_v1 = vld [vmem:[#allocation19_spill] sm:$0xff] }
 0x332   :  { %828 = vmatpush.msrb.mxu0 %v2027_v2  ;;  %848 = vmatpush.msrb.mxu1 %v2033_v3  ;;  %v2630_v2 = vld [vmem:[#allocation20_spill] sm:$0xff]  ;;  %v2631_v3 = vld [vmem:[#allocation21_spill] sm:$0xff] }
 0x333   :  { %868 = vmatpush.msrb.mxu2 %v2039_v4  ;;  %888 = vmatpush.msrb.mxu3 %v2045_v5  ;;  %v2632_v4 = vld [vmem:[#allocation23_spill] sm:$0xff]  ;;  %v963_v5 = vld [vmem:[%s2448_s0 + $0xa0] sm:$0xff] }
 0x334   :  { %829 = vmatpush.msrb.mxu0 %v2051_v6  ;;  %849 = vmatpush.msrb.mxu1 %v2057_v7  ;;  %v964_v6 = vld [vmem:[%s2448_s0 + $0xa8] sm:$0xff] }
 0x335   :  { %869 = vmatpush.msrb.mxu2 %v2063_v8  ;;  %889 = vmatpush.msrb.mxu3 %v2069_v9 }
 0x336   :  { %830 = vmatpush.msrb.mxu0 %v2075_v10  ;;  %850 = vmatpush.msrb.mxu1 %v2081_v11 }
 0x337   :  { %870 = vmatpush.msrb.mxu2 %v2087_v12  ;;  %890 = vmatpush.msrb.mxu3 %v2093_v13  ;;  %v965_v13 = vld [vmem:[%s2448_s0 + $0xb0] sm:$0xff] }
 0x338   :  { %831 = vmatpush.msrb.mxu0 %v2099_v14  ;;  %851 = vmatpush.msrb.mxu1 %v2105_v15  ;;  %v966_v14 = vld [vmem:[%s2448_s0 + $0xb8] sm:$0xff] }
 0x339   :  { %871 = vmatpush.msrb.mxu2 %v2111_v16  ;;  %891 = vmatpush.msrb.mxu3 %v2117_v17 }
 0x33a   :  { %832 = vmatpush.msrb.mxu0 %v2123_v18  ;;  %852 = vmatpush.msrb.mxu1 %v2129_v19 }
 0x33b   :  { %872 = vmatpush.msrb.mxu2 %v2135_v20  ;;  %892 = vmatpush.msrb.mxu3 %v2141_v21 }
 0x33c   :  { %833 = vmatpush.msrb.mxu0 %v2147_v22  ;;  %853 = vmatpush.msrb.mxu1 %v2153_v23 }
 0x33d   :  { %873 = vmatpush.msrb.mxu2 %v2159_v24  ;;  %893 = vmatpush.msrb.mxu3 %v2165_v25 }
 0x33e   :  { %834 = vmatpush.msrb.mxu0 %v2171_v26  ;;  %854 = vmatpush.msrb.mxu1 %v2177_v27 }
 0x33f   :  { %874 = vmatpush.msrb.mxu2 %v2183_v28  ;;  %894 = vmatpush.msrb.mxu3 %v2189_v29 }
 0x340   :  { %835 = vmatpush.msrb.mxu0 %v2613_v44  ;;  %855 = vmatpush.msrb.mxu1 %v2614_v50 }
 0x341   :  { %875 = vmatpush.msrb.mxu2 %v2615_v51  ;;  %895 = vmatpush.msrb.mxu3 %v2616_v49 }
 0x342   :  { %836 = vmatpush.msrb.mxu0 %v2617_v52  ;;  %856 = vmatpush.msrb.mxu1 %v2618_v58 }
 0x343   :  { %876 = vmatpush.msrb.mxu2 %v2619_v53  ;;  %896 = vmatpush.msrb.mxu3 %v2620_v63 }
 0x344   :  { %837 = vmatpush.msrb.mxu0 %v2621_v62  ;;  %857 = vmatpush.msrb.mxu1 %v2622_v59 }
 0x345   :  { %877 = vmatpush.msrb.mxu2 %v2623_v57  ;;  %897 = vmatpush.msrb.mxu3 %v2624_v54 }
 0x346   :  { %838 = vmatpush.msrb.mxu0 %v2625_v60  ;;  %858 = vmatpush.msrb.mxu1 %v2626_v61 }
 0x347   :  { %878 = vmatpush.msrb.mxu2 %v2627_v55  ;;  %898 = vmatpush.msrb.mxu3 %v2628_v0 }
 0x348   :  { %839 = vmatpush.msrb.mxu0 %v2629_v1  ;;  %859 = vmatpush.msrb.mxu1 %v2630_v2  ;;  %v973_v1 = vld [vmem:[%s2448_s0 + $0xe0] sm:$0xff]  ;;  %v974_v2 = vld [vmem:[%s2448_s0 + $0xe8] sm:$0xff] }
 0x349   :  { %879 = vmatpush.msrb.mxu2 %v2631_v3  ;;  %899 = vmatpush.msrb.mxu3 %v2632_v4 }
 0x3a5   :  { %v631_v7 = vpop.f32.mrf.mxu0  ;;  %v651_v8 = vpop.f32.mrf.mxu1 }
 0x3a6   :  { %v632_v9 = vadd.f32 %v963_v5, %v631_v7  ;;  %v652_v10 = vadd.f32 %v964_v6, %v651_v8 }
 0x3a8   :  { %v694_v11 = vmul.f32 0.5, %v632_v9  ;;  %v698_v12 = vmul.f32 0.5, %v652_v10  ;;  %v975_v9 = vld [vmem:[%s2448_s0 + $0xf0] sm:$0xff]  ;;  %v976_v10 = vld [vmem:[%s2448_s0 + $0xf8] sm:$0xff] }
 0x3aa   :  { %1029 = vtanh.f32 %v694_v11 }
 0x3ab   :  { %1031 = vtanh.f32 %v698_v12 }
 0x3ac   :  { %v671_v15 = vpop.f32.mrf.mxu2  ;;  %v691_v16 = vpop.f32.mrf.mxu3 }
 0x3ad   :  { %v672_v17 = vadd.f32 %v965_v13, %v671_v15  ;;  %v692_v18 = vadd.f32 %v966_v14, %v691_v16 }
 0x3af   :  { %1033 = vtanh.f32 %v672_v17  ;;  %v703_v19 = vmul.f32 0.5, %v692_v18 }
 0x3b0   :  { %v1030_v20 = vpop.eup %1029 }
 0x3b1   :  { %v1032_v21 = vpop.eup %1031  ;;  %v696_v22 = vmul.f32 0.5, %v1030_v20  ;;  %1035 = vtanh.f32 %v703_v19 }
 0x3b2   :  { %v700_v23 = vmul.f32 0.5, %v1032_v21 }
 0x3b3   :  { %v697_v24 = vadd.f32 0.5, %v696_v22 }
 0x3b4   :  { %v701_v25 = vadd.f32 0.5, %v700_v23 }
 0x3b5   :  { %v1034_v26 = vpop.eup %1033 }
 0x3b6   :  { %v707_v27 = vmul.f32 %v701_v25, %v2325_v30  ;;  %v708_v28 = vmul.f32 %v1034_v26, %v697_v24  ;;  %v968_v30 = vld [vmem:[%s2448_s0 + $0xc0] sm:$0xff] }
 0x3b7   :  { %v1036_v29 = vpop.eup %1035 }
 0x3b8   :  { %v709_v31 = vadd.f32 %v708_v28, %v707_v27  ;;  %v705_v32 = vmul.f32 0.5, %v1036_v29 }
 0x3ba   :  { %1037 = vtanh.f32 %v709_v31  ;;  %v706_v33 = vadd.f32 0.5, %v705_v32 }
 0x3c0   :  { %v1038_v34 = vpop.eup %1037 }
 0x3c1   :  { %v711_v39 = vmul.f32 %v1038_v34, %v706_v33 }
 0x3c3   :  { %967 = vst [vmem:[%s2449_s2 + $0x28] sm:$0xff] %v711_v39  ;;  %735 = vmatmul.f32.vlgmr.msra.gmra.mxu0 %v711_v39  ;;  %755 = vmatmul.f32.vlgmr.msra.gmra.mxu1 %v711_v39 }
 0x3c4   :  { %775 = vmatmul.f32.vlgmr.msra.gmra.mxu2 %v711_v39  ;;  %795 = vmatmul.f32.vlgmr.msra.gmra.mxu3 %v711_v39 }
 0x440   :  { %v736_v45 = vpop.f32.mrf.mxu0  ;;  %v756_v46 = vpop.f32.mrf.mxu1 }
 0x441   :  { %v737_v43 = vadd.f32 %v968_v30, %v736_v45  ;;  %v757_v42 = vadd.f32 %v969_v40, %v756_v46 }
 0x443   :  { %v799_v41 = vmul.f32 0.5, %v737_v43  ;;  %v803_v47 = vmul.f32 0.5, %v757_v42 }
 0x445   :  { %1039 = vtanh.f32 %v799_v41 }
 0x446   :  { %1041 = vtanh.f32 %v803_v47 }
 0x447   :  { %v776_v38 = vpop.f32.mrf.mxu2  ;;  %v796_v37 = vpop.f32.mrf.mxu3 }
 0x448   :  { %v777_v36 = vadd.f32 %v970_v48, %v776_v38  ;;  %v797_v35 = vadd.f32 %v971_v56, %v796_v37 }
 0x44a   :  { %1043 = vtanh.f32 %v777_v36  ;;  %v808_v44 = vmul.f32 0.5, %v797_v35 }
 0x44b   :  { %v1040_v50 = vpop.eup %1039 }
 0x44c   :  { %v1042_v51 = vpop.eup %1041  ;;  %v801_v49 = vmul.f32 0.5, %v1040_v50  ;;  %1045 = vtanh.f32 %v808_v44 }
 0x44d   :  { %v805_v52 = vmul.f32 0.5, %v1042_v51 }
 0x44e   :  { %v802_v58 = vadd.f32 0.5, %v801_v49 }
 0x44f   :  { %v806_v53 = vadd.f32 0.5, %v805_v52 }
 0x450   :  { %v1044_v63 = vpop.eup %1043 }
 0x451   :  { %v812_v62 = vmul.f32 %v806_v53, %v709_v31  ;;  %v813_v59 = vmul.f32 %v1044_v63, %v802_v58 }
 0x452   :  { %v1046_v57 = vpop.eup %1045 }
 0x453   :  { %v814_v54 = vadd.f32 %v813_v59, %v812_v62  ;;  %v810_v60 = vmul.f32 0.5, %v1046_v57 }
 0x455   :  { %1047 = vtanh.f32 %v814_v54  ;;  %v811_v61 = vadd.f32 0.5, %v810_v60 }
 0x45b   :  { %v1048_v55 = vpop.eup %1047 }
 0x45c   :  { %v816_v0 = vmul.f32 %v1048_v55, %v811_v61 }
 0x45e   :  { %972 = vst [vmem:[%s2449_s2 + $0x30] sm:$0xff] %v816_v0  ;;  %840 = vmatmul.f32.vlgmr.msrb.gmra.mxu0 %v816_v0  ;;  %860 = vmatmul.f32.vlgmr.msrb.gmra.mxu1 %v816_v0 }
 0x45f   :  { %880 = vmatmul.f32.vlgmr.msrb.gmra.mxu2 %v816_v0  ;;  %900 = vmatmul.f32.vlgmr.msrb.gmra.mxu3 %v816_v0 }
 0x4db   :  { %v841_v3 = vpop.f32.mrf.mxu0  ;;  %v861_v4 = vpop.f32.mrf.mxu1 }
 0x4dc   :  { %v842_v5 = vadd.f32 %v973_v1, %v841_v3  ;;  %v862_v6 = vadd.f32 %v974_v2, %v861_v4 }
 0x4de   :  { %v904_v7 = vmul.f32 0.5, %v842_v5  ;;  %v908_v8 = vmul.f32 0.5, %v862_v6 }
 0x4e0   :  { %1049 = vtanh.f32 %v904_v7 }
 0x4e1   :  { %1051 = vtanh.f32 %v908_v8 }
 0x4e2   :  { %v881_v11 = vpop.f32.mrf.mxu2  ;;  %v901_v12 = vpop.f32.mrf.mxu3 }
 0x4e3   :  { %v882_v13 = vadd.f32 %v975_v9, %v881_v11  ;;  %v902_v14 = vadd.f32 %v976_v10, %v901_v12 }
 0x4e5   :  { %1053 = vtanh.f32 %v882_v13  ;;  %v913_v15 = vmul.f32 0.5, %v902_v14 }
 0x4e6   :  { %v1050_v16 = vpop.eup %1049 }
 0x4e7   :  { %v1052_v17 = vpop.eup %1051  ;;  %v906_v18 = vmul.f32 0.5, %v1050_v16  ;;  %1055 = vtanh.f32 %v913_v15 }
 0x4e8   :  { %v910_v19 = vmul.f32 0.5, %v1052_v17 }
 0x4e9   :  { %v907_v20 = vadd.f32 0.5, %v906_v18 }
 0x4ea   :  { %v911_v21 = vadd.f32 0.5, %v910_v19 }
 0x4eb   :  { %v1054_v22 = vpop.eup %1053 }
 0x4ec   :  { %v917_v23 = vmul.f32 %v911_v21, %v814_v54  ;;  %v918_v24 = vmul.f32 %v1054_v22, %v907_v20 }
 0x4ed   :  { %v1056_v25 = vpop.eup %1055 }
 0x4ee   :  { %v919_v26 = vadd.f32 %v918_v24, %v917_v23  ;;  %v915_v27 = vmul.f32 0.5, %v1056_v25 }
 0x4f0   :  { %1057 = vtanh.f32 %v919_v26  ;;  %930 = vst [vmem:[%s2450_s4] sm:$0xff] %v919_v26  ;;  %v916_v28 = vadd.f32 0.5, %v915_v27 }
 0x4f6   :  { %v1058_v29 = vpop.eup %1057 }
 0x4f7   :  { %v921_v31 = vmul.f32 %v1058_v29, %v916_v28 }
 0x4f9   :  { %977 = vst [vmem:[%s2449_s2 + $0x38] sm:$0xff] %v921_v31 }
 0x4fa   :  { %929 = vst [vmem:[%s2451_s3] sm:$0xff] %v921_v31 }

</bundles_post_ra>
